<compile_context>
chip_gen: v6e
topology: v6e:2x2x1
jax: 0.10.0
libtpu: 0.0.40
codegen_flags: <defaults>
</compile_context>

<pallas_src>
import functools
import math

import jax
import jax.numpy as jnp
from jax.experimental import pallas as pl
from jax.experimental.pallas import tpu as pltpu

LN_EPS = 1e-12          # BERT LayerNorm eps
NEG_INF = -10000.0      # BERT extended-attention-mask fill value


def _vmem_capacity_bytes():
    """Physical VMEM per core; conservative 64 MiB (v7x) if the query fails."""
    try:
        cap = int(pltpu.get_tpu_info().vmem_capacity_bytes)
        if cap >= (32 << 20):
            return cap
    except Exception:
        pass
    return 64 << 20


_VMEM_CAP = _vmem_capacity_bytes()
# Leave headroom for Mosaic internal scratch / semaphores (matters on 64 MiB v7x).
VMEM_LIMIT = min(100 << 20, (_VMEM_CAP * 3) // 4)
# Row tiles: 512 only where VMEM is plentiful (v5e/v6e: 128 MiB); 256 otherwise (v7x).
_ROW_TILES = (512, 256, 128, 64, 32, 16, 8) if _VMEM_CAP >= (100 << 20) \
    else (256, 128, 64, 32, 16, 8)
_ATTN_Q_TILES = (256, 128, 64, 32, 16, 8)


def _pick_tile(n, candidates):
    """Largest tile from `candidates` that divides n (falls back to n itself)."""
    for t in candidates:
        if n % t == 0:
            return t
    return n


def _compiler_params(*semantics):
    return pltpu.CompilerParams(dimension_semantics=semantics,
                                vmem_limit_bytes=VMEM_LIMIT)


# ------------------- single-buffered resident-weight BlockSpecs -------------------

def _probe_kernel(x_ref, o_ref):
    o_ref[...] = x_ref[...]


@functools.lru_cache(maxsize=None)
def _buffered_ok():
    """True iff this JAX build accepts pipeline_mode=pl.Buffered on pallas_call specs."""
    try:
        fn = pl.pallas_call(
            _probe_kernel,
            grid=(1,),
            in_specs=[pl.BlockSpec((8, 128), lambda i: (0, 0),
                                   pipeline_mode=pl.Buffered(1))],
            out_specs=pl.BlockSpec((8, 128), lambda i: (0, 0)),
            out_shape=jax.ShapeDtypeStruct((8, 128), jnp.float32),
        )
        x = jnp.arange(8 * 128, dtype=jnp.float32).reshape(8, 128)
        y = jax.block_until_ready(fn(x))
        return bool(jnp.array_equal(x, y))
    except Exception:
        return False


def _resident_spec(block_shape, index_map):
    """Spec for weights whose block index never changes: skip double buffering when
    pipeline_mode is supported (halves resident-weight VMEM, key on v7x)."""
    if _buffered_ok():
        return pl.BlockSpec(block_shape, index_map, pipeline_mode=pl.Buffered(1))
    return pl.BlockSpec(block_shape, index_map)


# ----------------------------- Pallas kernels -----------------------------

def _ln_kernel(x_ref, g_ref, b_ref, o_ref):
    """o = LayerNorm(x) (embedding LayerNorm)."""
    x = x_ref[...].astype(jnp.float32)
    mu = jnp.mean(x, axis=-1, keepdims=True)
    var = jnp.mean((x - mu) ** 2, axis=-1, keepdims=True)
    o_ref[...] = ((x - mu) * jax.lax.rsqrt(var + LN_EPS) * g_ref[...]
                  + b_ref[...]).astype(o_ref.dtype)


def _qkv_kernel(x_ref, w_ref, b_ref, q_ref, k_ref, v_ref, *, H):
    """Fused QKV projection; 1/sqrt(dh) is pre-folded into the Q weight columns."""
    y = jnp.dot(x_ref[...], w_ref[...], preferred_element_type=jnp.float32) + b_ref[...]
    q_ref[...] = y[:, 0:H].astype(q_ref.dtype)
    k_ref[...] = y[:, H:2 * H].astype(k_ref.dtype)
    v_ref[...] = y[:, 2 * H:3 * H].astype(v_ref.dtype)


def _attn_kernel(q_ref, k_ref, v_ref, bias_ref, o_ref, *, heads, dh, approx_recip):
    """Attention for one (batch, q-tile): full-sequence K/V block, per-head softmax.

    q/k/v blocks: (tq, H) / (S, H) / (S, H) with heads contiguous in the hidden dim
    (static column slices per head, no head transposes in XLA).  Each head's softmax
    state (m, l) lives only in registers and its normalized context is stored
    directly into o_ref[:, h*dh:(h+1)*dh] -- no online-softmax scratch, no epilogue
    concatenate.  bias block: (1, 1, S) additive mask, broadcast over rows and heads.
    """
    bias = bias_ref[0]                                    # (1, S) f32
    for h in range(heads):                                # static unroll; each head's
        lo = h * dh                                       # result is stored before the
        q_h = q_ref[:, lo:lo + dh]                        # next head, bounding live set
        k_h = k_ref[:, lo:lo + dh]
        v_h = v_ref[:, lo:lo + dh]
        s = jnp.einsum("qd,kd->qk", q_h, k_h,
                       preferred_element_type=jnp.float32) + bias         # (tq, S)
        m = jnp.max(s, axis=-1, keepdims=True)
        p = jnp.exp(s - m)
        l = jnp.sum(p, axis=-1, keepdims=True)
        ctx = jnp.dot(p.astype(v_h.dtype), v_h, preferred_element_type=jnp.float32)
        if approx_recip:
            ctx = ctx * pl.reciprocal(l, approx=True)     # EUP slot, bf16 path
        else:
            ctx = ctx / l                                 # exact, f32 verification path
        o_ref[:, lo:lo + dh] = ctx.astype(o_ref.dtype)


def _linear_res_ln_kernel(x_ref, w_ref, b_ref, res_ref, g_ref, bln_ref, o_ref):
    """o = LayerNorm(x @ w + b + res) -- matmul with fused residual + LN epilogue."""
    y = jnp.dot(x_ref[...], w_ref[...], preferred_element_type=jnp.float32)
    y = y + b_ref[...] + res_ref[...].astype(jnp.float32)
    mu = jnp.mean(y, axis=-1, keepdims=True)
    var = jnp.mean((y - mu) ** 2, axis=-1, keepdims=True)
    o_ref[...] = ((y - mu) * jax.lax.rsqrt(var + LN_EPS) * g_ref[...]
                  + bln_ref[...]).astype(o_ref.dtype)


def _ffn_kernel(x_ref, wi_ref, bi_ref, wo_ref, bo_ref, g_ref, bln_ref, o_ref):
    """o = LayerNorm(gelu(x @ wi + bi) @ wo + bo + x).  Both FFN matmuls in one pass;
    the (tr, 4H) intermediate never leaves VMEM."""
    x = x_ref[...]
    h = jnp.dot(x, wi_ref[...], preferred_element_type=jnp.float32) + bi_ref[...]
    # TODO(synk): HF BERT uses exact (erf) GELU; tanh-approx GELU used here.
    h = jax.nn.gelu(h, approximate=True).astype(wo_ref.dtype)
    y = jnp.dot(h, wo_ref[...], preferred_element_type=jnp.float32)
    y = y + bo_ref[...] + x.astype(jnp.float32)
    mu = jnp.mean(y, axis=-1, keepdims=True)
    var = jnp.mean((y - mu) ** 2, axis=-1, keepdims=True)
    o_ref[...] = ((y - mu) * jax.lax.rsqrt(var + LN_EPS) * g_ref[...]
                  + bln_ref[...]).astype(o_ref.dtype)


def _pool_cls_kernel(x_ref, pm_ref, w1_ref, b1_ref, w2_ref, b2_ref, o_ref):
    """Masked-mean pooling (block-diagonal pooling matrix, 1/length pre-folded) fused
    with the Linear/Tanh/Linear classifier -- whole batch in one grid step."""
    pooled = jnp.dot(pm_ref[...], x_ref[...].astype(jnp.float32),
                     preferred_element_type=jnp.float32)                   # (B, H)
    hdn = jnp.tanh(jnp.dot(pooled, w1_ref[...],
                           preferred_element_type=jnp.float32) + b1_ref[...])
    o_ref[...] = jnp.dot(hdn, w2_ref[...],
                         preferred_element_type=jnp.float32) + b2_ref[...]


# ----------------------------- kernel wrappers -----------------------------

def layernorm(x, gamma, beta, out_dtype):
    R, H = x.shape
    tr = _pick_tile(R, _ROW_TILES)
    return pl.pallas_call(
        _ln_kernel,
        grid=(R // tr,),
        in_specs=[pl.BlockSpec((tr, H), lambda i: (i, 0)),
                  _resident_spec((1, H), lambda i: (0, 0)),
                  _resident_spec((1, H), lambda i: (0, 0))],
        out_specs=pl.BlockSpec((tr, H), lambda i: (i, 0)),
        out_shape=jax.ShapeDtypeStruct((R, H), out_dtype),
        compiler_params=_compiler_params("parallel"),
    )(x, gamma, beta)


def qkv_projection(x, wqkv, bqkv, *, H):
    R, _ = x.shape
    tr = _pick_tile(R, _ROW_TILES)
    out = jax.ShapeDtypeStruct((R, H), x.dtype)
    out_spec = pl.BlockSpec((tr, H), lambda i: (i, 0))
    return pl.pallas_call(
        functools.partial(_qkv_kernel, H=H),
        grid=(R // tr,),
        in_specs=[pl.BlockSpec((tr, H), lambda i: (i, 0)),
                  _resident_spec((H, 3 * H), lambda i: (0, 0)),
                  _resident_spec((1, 3 * H), lambda i: (0, 0))],
        out_specs=(out_spec, out_spec, out_spec),
        out_shape=(out, out, out),
        compiler_params=_compiler_params("parallel"),
    )(x, wqkv, bqkv)


def attention(q, k, v, bias3d, *, B, S, heads, approx_recip):
    R, H = q.shape
    dh = H // heads
    tq = _pick_tile(S, _ATTN_Q_TILES)
    nq = S // tq
    return pl.pallas_call(
        functools.partial(_attn_kernel, heads=heads, dh=dh, approx_recip=approx_recip),
        grid=(B, nq),
        in_specs=[
            pl.BlockSpec((tq, H), lambda b, qi: (b * nq + qi, 0)),
            # Full-sequence K/V for batch b: index constant in qi, so it is DMA'd once
            # per batch element and reused across q tiles (fits VMEM for BERT-scale S).
            pl.BlockSpec((S, H), lambda b, qi: (b, 0)),
            pl.BlockSpec((S, H), lambda b, qi: (b, 0)),
            pl.BlockSpec((1, 1, S), lambda b, qi: (b, 0, 0)),
        ],
        out_specs=pl.BlockSpec((tq, H), lambda b, qi: (b * nq + qi, 0)),
        out_shape=jax.ShapeDtypeStruct((R, H), q.dtype),
        compiler_params=_compiler_params("parallel", "parallel"),
    )(q, k, v, bias3d)


def linear_residual_layernorm(x, w, b, res, gamma, beta):
    R, Din = x.shape
    Dout = w.shape[1]
    tr = _pick_tile(R, _ROW_TILES)
    return pl.pallas_call(
        _linear_res_ln_kernel,
        grid=(R // tr,),
        in_specs=[
            pl.BlockSpec((tr, Din), lambda i: (i, 0)),
            _resident_spec((Din, Dout), lambda i: (0, 0)),
            _resident_spec((1, Dout), lambda i: (0, 0)),
            pl.BlockSpec((tr, Dout), lambda i: (i, 0)),
            _resident_spec((1, Dout), lambda i: (0, 0)),
            _resident_spec((1, Dout), lambda i: (0, 0)),
        ],
        out_specs=pl.BlockSpec((tr, Dout), lambda i: (i, 0)),
        out_shape=jax.ShapeDtypeStruct((R, Dout), x.dtype),
        compiler_params=_compiler_params("parallel"),
    )(x, w, b, res, gamma, beta)


def ffn_residual_layernorm(x, wi, bi, wo, bo, gamma, beta):
    R, H = x.shape
    inter = wi.shape[1]
    tr = _pick_tile(R, _ROW_TILES)
    return pl.pallas_call(
        _ffn_kernel,
        grid=(R // tr,),
        in_specs=[
            pl.BlockSpec((tr, H), lambda i: (i, 0)),
            _resident_spec((H, inter), lambda i: (0, 0)),
            _resident_spec((1, inter), lambda i: (0, 0)),
            _resident_spec((inter, H), lambda i: (0, 0)),
            _resident_spec((1, H), lambda i: (0, 0)),
            _resident_spec((1, H), lambda i: (0, 0)),
            _resident_spec((1, H), lambda i: (0, 0)),
        ],
        out_specs=pl.BlockSpec((tr, H), lambda i: (i, 0)),
        out_shape=jax.ShapeDtypeStruct((R, H), x.dtype),
        compiler_params=_compiler_params("parallel"),
    )(x, wi, bi, wo, bo, gamma, beta)


def pooled_classifier(x, pool_mat, w1, b1, w2, b2):
    R, H = x.shape
    B = pool_mat.shape[0]
    return pl.pallas_call(
        _pool_cls_kernel,
        grid=(1,),
        in_specs=[
            pl.BlockSpec((R, H), lambda i: (0, 0)),
            pl.BlockSpec((B, R), lambda i: (0, 0)),
            _resident_spec((H, H), lambda i: (0, 0)),
            _resident_spec((1, H), lambda i: (0, 0)),
            _resident_spec((H, 2), lambda i: (0, 0)),
            _resident_spec((1, 2), lambda i: (0, 0)),
        ],
        out_specs=pl.BlockSpec((B, 2), lambda i: (0, 0)),
        out_shape=jax.ShapeDtypeStruct((B, 2), jnp.float32),
        compiler_params=_compiler_params("arbitrary"),
    )(x, pool_mat, w1, b1, w2, b2)


# ----------------------------- parameter init / prep -----------------------------

def init_params(key, *, vocab, type_vocab, max_pos, hidden, inter, layers):
    keys = iter(jax.random.split(key, 64))

    def w(shape, scale=0.02):
        return (scale * jax.random.normal(next(keys), shape)).astype(jnp.float32)

    def zeros(*shape):
        return jnp.zeros(shape, jnp.float32)

    def ones(*shape):
        return jnp.ones(shape, jnp.float32)

    params = {
        "word_emb": w((vocab, hidden)),
        "pos_emb": w((max_pos, hidden)),
        "type_emb": w((type_vocab, hidden)),
        "emb_ln_g": ones(hidden), "emb_ln_b": zeros(hidden),
        "layers": [],
        "cls_w1": w((hidden, hidden)), "cls_b1": zeros(hidden),
        "cls_w2": w((hidden, 2)), "cls_b2": zeros(2),
    }
    for _ in range(layers):
        params["layers"].append({
            "wq": w((hidden, hidden)), "bq": zeros(hidden),
            "wk": w((hidden, hidden)), "bk": zeros(hidden),
            "wv": w((hidden, hidden)), "bv": zeros(hidden),
            "wo": w((hidden, hidden)), "bo": zeros(hidden),
            "attn_ln_g": ones(hidden), "attn_ln_b": zeros(hidden),
            "wi": w((hidden, inter)), "bi": zeros(inter),
            "wo2": w((inter, hidden)), "bo2": zeros(hidden),
            "ffn_ln_g": ones(hidden), "ffn_ln_b": zeros(hidden),
        })
    return params


def prepare_params(raw, compute_dtype, *, heads):
    """One-time parameter prep (run OUTSIDE jit): fuse QKV into one (H, 3H) slab,
    fold 1/sqrt(dh) into the Q columns, reshape biases/LN params to (1, D) f32 and
    cast the big weights to the compute dtype -- so none of this re-runs per forward."""
    H = raw["word_emb"].shape[1]
    scale = 1.0 / math.sqrt(H // heads)
    dt = compute_dtype

    def row(v):
        return v.reshape(1, -1).astype(jnp.float32)

    prepped = {
        "word_emb": raw["word_emb"].astype(jnp.float32),
        "pos_emb": raw["pos_emb"].astype(jnp.float32),
        "type_emb": raw["type_emb"].astype(jnp.float32),
        "emb_ln_g": row(raw["emb_ln_g"]), "emb_ln_b": row(raw["emb_ln_b"]),
        "cls_w1": raw["cls_w1"].astype(jnp.float32), "cls_b1": row(raw["cls_b1"]),
        "cls_w2": raw["cls_w2"].astype(jnp.float32), "cls_b2": row(raw["cls_b2"]),
        "layers": [],
    }
    for lp in raw["layers"]:
        prepped["layers"].append({
            "wqkv": jnp.concatenate([lp["wq"] * scale, lp["wk"], lp["wv"]],
                                    axis=1).astype(dt),
            "bqkv": jnp.concatenate([lp["bq"] * scale, lp["bk"], lp["bv"]]
                                    ).reshape(1, -1).astype(jnp.float32),
            "wo": lp["wo"].astype(dt), "bo": row(lp["bo"]),
            "attn_ln_g": row(lp["attn_ln_g"]), "attn_ln_b": row(lp["attn_ln_b"]),
            "wi": lp["wi"].astype(dt), "bi": row(lp["bi"]),
            "wo2": lp["wo2"].astype(dt), "bo2": row(lp["bo2"]),
            "ffn_ln_g": row(lp["ffn_ln_g"]), "ffn_ln_b": row(lp["ffn_ln_b"]),
        })
    return prepped


# ----------------------------- forward (Pallas) -----------------------------

def triple_selector_forward(params, input_ids, token_type_ids, attention_mask, *,
                            heads, compute_dtype=jnp.bfloat16):
    """Forward over *prepared* params (see prepare_params)."""
    B, S = input_ids.shape
    H = params["word_emb"].shape[1]
    dtype = compute_dtype

    # Embedding gathers + sum stay as XLA glue (gather has no clean Pallas win); the
    # embedding LayerNorm runs as a Pallas kernel.
    emb = (params["word_emb"][input_ids]
           + params["pos_emb"][jnp.arange(S)][None, :, :]
           + params["type_emb"][token_type_ids])
    x = layernorm(emb.reshape(B * S, H), params["emb_ln_g"], params["emb_ln_b"],
                  out_dtype=dtype)

    mask_f = attention_mask.astype(jnp.float32)                 # (B, S)
    bias3d = ((1.0 - mask_f) * NEG_INF).reshape(B, 1, S)        # additive mask (B,1,S)

    for lp in params["layers"]:
        q, k, v = qkv_projection(x, lp["wqkv"], lp["bqkv"], H=H)
        ctx = attention(q, k, v, bias3d, B=B, S=S, heads=heads,
                        approx_recip=(dtype != jnp.float32))
        x = linear_residual_layernorm(ctx, lp["wo"], lp["bo"], x,
                                      lp["attn_ln_g"], lp["attn_ln_b"])
        x = ffn_residual_layernorm(x, lp["wi"], lp["bi"], lp["wo2"], lp["bo2"],
                                   lp["ffn_ln_g"], lp["ffn_ln_b"])

    # create_entity_query (masked mean) + classifier: block-diagonal pooling matrix
    # with 1/length folded in (tiny XLA glue), then a single fused Pallas call.
    lengths = jnp.maximum(mask_f.sum(axis=1, keepdims=True), 1.0)
    pool_rows = mask_f / lengths                                 # (B, S)
    pool_mat = (jnp.eye(B, dtype=jnp.float32)[:, :, None]
                * pool_rows[None, :, :]).reshape(B, B * S)       # (B, B*S)
    logits = pooled_classifier(x, pool_mat, params["cls_w1"], params["cls_b1"],
                               params["cls_w2"], params["cls_b2"])
    return (logits,)


# ----------------------------- pure-JAX reference -----------------------------

def ref_forward(params, input_ids, token_type_ids, attention_mask, *, heads):
    B, S = input_ids.shape
    H = params["word_emb"].shape[1]
    dh = H // heads

    def ln(h, g, b):
        mu = jnp.mean(h, axis=-1, keepdims=True)
        var = jnp.mean((h - mu) ** 2, axis=-1, keepdims=True)
        return (h - mu) * jax.lax.rsqrt(var + LN_EPS) * g + b

    emb = (params["word_emb"][input_ids]
           + params["pos_emb"][jnp.arange(S)][None]
           + params["type_emb"][token_type_ids]).astype(jnp.float32)
    x = ln(emb, params["emb_ln_g"], params["emb_ln_b"])
    mask_f = attention_mask.astype(jnp.float32)
    bias = (1.0 - mask_f)[:, None, None, :] * NEG_INF
    for lp in params["layers"]:
        q = (x @ lp["wq"] + lp["bq"]).reshape(B, S, heads, dh).transpose(0, 2, 1, 3)
        k = (x @ lp["wk"] + lp["bk"]).reshape(B, S, heads, dh).transpose(0, 2, 1, 3)
        v = (x @ lp["wv"] + lp["bv"]).reshape(B, S, heads, dh).transpose(0, 2, 1, 3)
        scores = jnp.einsum("bhqd,bhkd->bhqk", q, k) / math.sqrt(dh) + bias
        p = jax.nn.softmax(scores, axis=-1)
        ctx = jnp.einsum("bhqk,bhkd->bhqd", p, v).transpose(0, 2, 1, 3).reshape(B, S, H)
        x = ln(ctx @ lp["wo"] + lp["bo"] + x, lp["attn_ln_g"], lp["attn_ln_b"])
        inter = jax.nn.gelu(x @ lp["wi"] + lp["bi"], approximate=True)
        x = ln(inter @ lp["wo2"] + lp["bo2"] + x, lp["ffn_ln_g"], lp["ffn_ln_b"])
    lengths = mask_f.sum(axis=1, keepdims=True)
    feats = (x * mask_f[:, :, None]).sum(axis=1) / lengths
    h = jnp.tanh(feats @ params["cls_w1"] + params["cls_b1"])
    return h @ params["cls_w2"] + params["cls_b2"]


# ----------------------------- main -----------------------------

if __name__ == "__main__":
    B, S, H, HEADS, INTER, LAYERS = 2, 16, 32, 4, 64, 2
    VOCAB, TYPE_VOCAB, MAX_POS = 64, 2, 32

    key = jax.random.PRNGKey(0)
    k_param, k_ids = jax.random.split(key)
    raw_params = init_params(k_param, vocab=VOCAB, type_vocab=TYPE_VOCAB,
                             max_pos=MAX_POS, hidden=H, inter=INTER, layers=LAYERS)

    input_ids = jax.random.randint(k_ids, (B, S), 0, VOCAB, dtype=jnp.int32)
    token_type_ids = jnp.concatenate(
        [jnp.zeros((B, S // 2), jnp.int32), jnp.ones((B, S // 2), jnp.int32)], axis=1)
    attention_mask = jnp.concatenate(
        [jnp.ones((1, S), jnp.int32),
         jnp.concatenate([jnp.ones((1, 10), jnp.int32),
                          jnp.zeros((1, S - 10), jnp.int32)], axis=1)], axis=0)

    _buffered_ok()   # resolve the pipeline_mode capability probe up front

    fwd = jax.jit(triple_selector_forward, static_argnames=("heads", "compute_dtype"))
    ref = ref_forward(raw_params, input_ids, token_type_ids, attention_mask, heads=HEADS)

    # f32 path: strict check against the pure-JAX reference.
    params_f32 = prepare_params(raw_params, jnp.float32, heads=HEADS)
    (logits_f32,) = fwd(params_f32, input_ids, token_type_ids, attention_mask,
                        heads=HEADS, compute_dtype=jnp.float32)
    logits_f32 = jax.block_until_ready(logits_f32)
    assert logits_f32.shape == (B, 2)
    assert jnp.allclose(logits_f32, ref, atol=2e-3, rtol=2e-3), (logits_f32, ref)

    # bf16 activations/weights (f32 accumulation) -- default production path.
    params_bf16 = prepare_params(raw_params, jnp.bfloat16, heads=HEADS)
    (logits_bf16,) = fwd(params_bf16, input_ids, token_type_ids, attention_mask,
                         heads=HEADS, compute_dtype=jnp.bfloat16)
    logits_bf16 = jax.block_until_ready(logits_bf16)
    assert logits_bf16.shape == (B, 2)
    assert bool(jnp.all(jnp.isfinite(logits_bf16.astype(jnp.float32))))
    assert jnp.allclose(logits_bf16.astype(jnp.float32), ref, atol=5e-2, rtol=5e-2)

    print("KERNEL_OK")
</pallas_src>

<mosaic_0001>
module attributes {stable_mosaic.version = 11 : i64} {
  func.func @_probe_kernel(%arg0: i32, %arg1: memref<8x128xf32, #tpu.memory_space<vmem>>, %arg2: memref<8x128xf32, #tpu.memory_space<vmem>>) attributes {dimension_semantics = [#tpu.dimension_semantics<arbitrary>], iteration_bounds = array<i64: 1>, scalar_prefetch = 0 : i64, scratch_operands = 0 : i64, tpu.core_type = #tpu.core_type<tc>, window_params = [{pipeline_mode = #tpu.pipeline_mode<synchronous>, transform_indices = @transform_0, window_bounds = array<i64: 8, 128>}, {pipeline_mode = #tpu.pipeline_mode<synchronous>, transform_indices = @transform_1, window_bounds = array<i64: 8, 128>}]} {
    %c0 = arith.constant 0 : index
    %c0_0 = arith.constant 0 : index
    %0 = vector.load %arg1[%c0, %c0_0] : memref<8x128xf32, #tpu.memory_space<vmem>>, vector<8x128xf32>
    %c0_1 = arith.constant 0 : index
    %c0_2 = arith.constant 0 : index
    %1 = vector.load %arg2[%c0_1, %c0_2] : memref<8x128xf32, #tpu.memory_space<vmem>>, vector<8x128xf32>
    tpu.vector_store %arg2[%c0_1, %c0_2], %0 {strides = array<i32>} : memref<8x128xf32, #tpu.memory_space<vmem>>, vector<8x128xf32>,
    return
  }
  func.func @transform_0(%arg0: i32) -> (i32, i32) {
    %c0_i32 = arith.constant 0 : i32
    %c0_i32_0 = arith.constant 0 : i32
    %c0_i32_1 = arith.constant 0 : i32
    return %c0_i32, %c0_i32_0 : i32, i32
  }
  func.func @transform_1(%arg0: i32) -> (i32, i32) {
    %c0_i32 = arith.constant 0 : i32
    %c0_i32_0 = arith.constant 0 : i32
    %c0_i32_1 = arith.constant 0 : i32
    return %c0_i32, %c0_i32_0 : i32, i32
  }
}

module attributes {stable_mosaic.version = 11 : i64} {
  func.func @_attn_kernel(%arg0: i32, %arg1: i32, %arg2: memref<16x32xf32, #tpu.memory_space<vmem>>, %arg3: memref<16x32xf32, #tpu.memory_space<vmem>>, %arg4: memref<16x32xf32, #tpu.memory_space<vmem>>, %arg5: memref<1x1x16xf32, #tpu.memory_space<vmem>>, %arg6: memref<16x32xf32, #tpu.memory_space<vmem>>) attributes {dimension_semantics = [#tpu.dimension_semantics<parallel>, #tpu.dimension_semantics<parallel>], iteration_bounds = array<i64: 2, 1>, scalar_prefetch = 0 : i64, scratch_operands = 0 : i64, tpu.core_type = #tpu.core_type<tc>, window_params = [{transform_indices = @transform_0, window_bounds = array<i64: 16, 32>}, {transform_indices = @transform_1, window_bounds = array<i64: 16, 32>}, {transform_indices = @transform_2, window_bounds = array<i64: 16, 32>}, {transform_indices = @transform_3, window_bounds = array<i64: 1, 1, 16>}, {transform_indices = @transform_4, window_bounds = array<i64: 16, 32>}]} {
    %c0 = arith.constant 0 : index
    %c0_0 = arith.constant 0 : index
    %c0_1 = arith.constant 0 : index
    %0 = vector.load %arg5[%c0, %c0_0, %c0_1] : memref<1x1x16xf32, #tpu.memory_space<vmem>>, vector<1x1x16xf32>
    %1 = vector.shape_cast %0 : vector<1x1x16xf32> to vector<1x16xf32>
    %c0_2 = arith.constant 0 : index
    %c0_3 = arith.constant 0 : index
    %2 = vector.load %arg2[%c0_2, %c0_3] : memref<16x32xf32, #tpu.memory_space<vmem>>, vector<16x8xf32>
    %c0_4 = arith.constant 0 : index
    %c0_5 = arith.constant 0 : index
    %3 = vector.load %arg3[%c0_4, %c0_5] : memref<16x32xf32, #tpu.memory_space<vmem>>, vector<16x8xf32>
    %c0_6 = arith.constant 0 : index
    %c0_7 = arith.constant 0 : index
    %4 = vector.load %arg4[%c0_6, %c0_7] : memref<16x32xf32, #tpu.memory_space<vmem>>, vector<16x8xf32>
    "tpu.trace_start"() <{level = 10 : i32, message = "qd,kd->qk"}> : () -> ()
    %cst = arith.constant dense<0.000000e+00> : vector<16x16xf32>
    %5 = tpu.matmul %2, %3, %cst {dimension_numbers = #tpu.dot_dimension_numbers<[1], [1], [0], [0], [0, 0, 1, 0], [], []>} : vector<16x8xf32>, vector<16x8xf32>, vector<16x16xf32> -> vector<16x16xf32>
    "tpu.trace_stop"() : () -> ()
    %6 = vector.broadcast %1 : vector<1x16xf32> to vector<16x16xf32>
    %7 = arith.addf %5, %6 : vector<16x16xf32>
    %cst_8 = arith.constant dense<0xFF800000> : vector<16xf32>
    %8 = vector.multi_reduction <maximumf>, %7, %cst_8 [1] : vector<16x16xf32> to vector<16xf32>
    %9 = vector.shape_cast %8 : vector<16xf32> to vector<16x1xf32>
    %10 = vector.broadcast %9 : vector<16x1xf32> to vector<16x16xf32>
    %11 = arith.subf %7, %10 : vector<16x16xf32>
    %12 = math.exp %11 : vector<16x16xf32>
    %cst_9 = arith.constant dense<0.000000e+00> : vector<16xf32>
    %13 = vector.multi_reduction <add>, %12, %cst_9 [1] : vector<16x16xf32> to vector<16xf32>
    %14 = vector.shape_cast %13 : vector<16xf32> to vector<16x1xf32>
    %cst_10 = arith.constant dense<0.000000e+00> : vector<16x8xf32>
    %15 = tpu.matmul %12, %4, %cst_10 {dimension_numbers = #tpu.dot_dimension_numbers<[1], [0], [0], [1], [0, 0, 1, 1], [], []>} : vector<16x16xf32>, vector<16x8xf32>, vector<16x8xf32> -> vector<16x8xf32>
    %16 = vector.broadcast %14 : vector<16x1xf32> to vector<16x8xf32>
    %17 = arith.divf %15, %16 : vector<16x8xf32>
    %c0_11 = arith.constant 0 : index
    %c0_12 = arith.constant 0 : index
    %18 = vector.load %arg6[%c0_11, %c0_12] : memref<16x32xf32, #tpu.memory_space<vmem>>, vector<16x8xf32>
    tpu.vector_store %arg6[%c0_11, %c0_12], %17 {strides = array<i32>} : memref<16x32xf32, #tpu.memory_space<vmem>>, vector<16x8xf32>,
    %c0_13 = arith.constant 0 : index
    %c8 = arith.constant 8 : index
    %19 = vector.load %arg2[%c0_13, %c8] : memref<16x32xf32, #tpu.memory_space<vmem>>, vector<16x8xf32>
    %c0_14 = arith.constant 0 : index
    %c8_15 = arith.constant 8 : index
    %20 = vector.load %arg3[%c0_14, %c8_15] : memref<16x32xf32, #tpu.memory_space<vmem>>, vector<16x8xf32>
    %c0_16 = arith.constant 0 : index
    %c8_17 = arith.constant 8 : index
    %21 = vector.load %arg4[%c0_16, %c8_17] : memref<16x32xf32, #tpu.memory_space<vmem>>, vector<16x8xf32>
    "tpu.trace_start"() <{level = 10 : i32, message = "qd,kd->qk"}> : () -> ()
    %cst_18 = arith.constant dense<0.000000e+00> : vector<16x16xf32>
    %22 = tpu.matmul %19, %20, %cst_18 {dimension_numbers = #tpu.dot_dimension_numbers<[1], [1], [0], [0], [0, 0, 1, 0], [], []>} : vector<16x8xf32>, vector<16x8xf32>, vector<16x16xf32> -> vector<16x16xf32>
    "tpu.trace_stop"() : () -> ()
    %23 = vector.broadcast %1 : vector<1x16xf32> to vector<16x16xf32>
    %24 = arith.addf %22, %23 : vector<16x16xf32>
    %cst_19 = arith.constant dense<0xFF800000> : vector<16xf32>
    %25 = vector.multi_reduction <maximumf>, %24, %cst_19 [1] : vector<16x16xf32> to vector<16xf32>
    %26 = vector.shape_cast %25 : vector<16xf32> to vector<16x1xf32>
    %27 = vector.broadcast %26 : vector<16x1xf32> to vector<16x16xf32>
    %28 = arith.subf %24, %27 : vector<16x16xf32>
    %29 = math.exp %28 : vector<16x16xf32>
    %cst_20 = arith.constant dense<0.000000e+00> : vector<16xf32>
    %30 = vector.multi_reduction <add>, %29, %cst_20 [1] : vector<16x16xf32> to vector<16xf32>
    %31 = vector.shape_cast %30 : vector<16xf32> to vector<16x1xf32>
    %cst_21 = arith.constant dense<0.000000e+00> : vector<16x8xf32>
    %32 = tpu.matmul %29, %21, %cst_21 {dimension_numbers = #tpu.dot_dimension_numbers<[1], [0], [0], [1], [0, 0, 1, 1], [], []>} : vector<16x16xf32>, vector<16x8xf32>, vector<16x8xf32> -> vector<16x8xf32>
    %33 = vector.broadcast %31 : vector<16x1xf32> to vector<16x8xf32>
    %34 = arith.divf %32, %33 : vector<16x8xf32>
    %c0_22 = arith.constant 0 : index
    %c8_23 = arith.constant 8 : index
    %35 = vector.load %arg6[%c0_22, %c8_23] : memref<16x32xf32, #tpu.memory_space<vmem>>, vector<16x8xf32>
    tpu.vector_store %arg6[%c0_22, %c8_23], %34 {strides = array<i32>} : memref<16x32xf32, #tpu.memory_space<vmem>>, vector<16x8xf32>,
    %c0_24 = arith.constant 0 : index
    %c16 = arith.constant 16 : index
    %36 = vector.load %arg2[%c0_24, %c16] : memref<16x32xf32, #tpu.memory_space<vmem>>, vector<16x8xf32>
    %c0_25 = arith.constant 0 : index
    %c16_26 = arith.constant 16 : index
    %37 = vector.load %arg3[%c0_25, %c16_26] : memref<16x32xf32, #tpu.memory_space<vmem>>, vector<16x8xf32>
    %c0_27 = arith.constant 0 : index
    %c16_28 = arith.constant 16 : index
    %38 = vector.load %arg4[%c0_27, %c16_28] : memref<16x32xf32, #tpu.memory_space<vmem>>, vector<16x8xf32>
    "tpu.trace_start"() <{level = 10 : i32, message = "qd,kd->qk"}> : () -> ()
    %cst_29 = arith.constant dense<0.000000e+00> : vector<16x16xf32>
    %39 = tpu.matmul %36, %37, %cst_29 {dimension_numbers = #tpu.dot_dimension_numbers<[1], [1], [0], [0], [0, 0, 1, 0], [], []>} : vector<16x8xf32>, vector<16x8xf32>, vector<16x16xf32> -> vector<16x16xf32>
    "tpu.trace_stop"() : () -> ()
    %40 = vector.broadcast %1 : vector<1x16xf32> to vector<16x16xf32>
    %41 = arith.addf %39, %40 : vector<16x16xf32>
    %cst_30 = arith.constant dense<0xFF800000> : vector<16xf32>
    %42 = vector.multi_reduction <maximumf>, %41, %cst_30 [1] : vector<16x16xf32> to vector<16xf32>
    %43 = vector.shape_cast %42 : vector<16xf32> to vector<16x1xf32>
    %44 = vector.broadcast %43 : vector<16x1xf32> to vector<16x16xf32>
    %45 = arith.subf %41, %44 : vector<16x16xf32>
    %46 = math.exp %45 : vector<16x16xf32>
    %cst_31 = arith.constant dense<0.000000e+00> : vector<16xf32>
    %47 = vector.multi_reduction <add>, %46, %cst_31 [1] : vector<16x16xf32> to vector<16xf32>
    %48 = vector.shape_cast %47 : vector<16xf32> to vector<16x1xf32>
    %cst_32 = arith.constant dense<0.000000e+00> : vector<16x8xf32>
    %49 = tpu.matmul %46, %38, %cst_32 {dimension_numbers = #tpu.dot_dimension_numbers<[1], [0], [0], [1], [0, 0, 1, 1], [], []>} : vector<16x16xf32>, vector<16x8xf32>, vector<16x8xf32> -> vector<16x8xf32>
    %50 = vector.broadcast %48 : vector<16x1xf32> to vector<16x8xf32>
    %51 = arith.divf %49, %50 : vector<16x8xf32>
    %c0_33 = arith.constant 0 : index
    %c16_34 = arith.constant 16 : index
    %52 = vector.load %arg6[%c0_33, %c16_34] : memref<16x32xf32, #tpu.memory_space<vmem>>, vector<16x8xf32>
    tpu.vector_store %arg6[%c0_33, %c16_34], %51 {strides = array<i32>} : memref<16x32xf32, #tpu.memory_space<vmem>>, vector<16x8xf32>,
    %c0_35 = arith.constant 0 : index
    %c24 = arith.constant 24 : index
    %53 = vector.load %arg2[%c0_35, %c24] : memref<16x32xf32, #tpu.memory_space<vmem>>, vector<16x8xf32>
    %c0_36 = arith.constant 0 : index
    %c24_37 = arith.constant 24 : index
    %54 = vector.load %arg3[%c0_36, %c24_37] : memref<16x32xf32, #tpu.memory_space<vmem>>, vector<16x8xf32>
    %c0_38 = arith.constant 0 : index
    %c24_39 = arith.constant 24 : index
    %55 = vector.load %arg4[%c0_38, %c24_39] : memref<16x32xf32, #tpu.memory_space<vmem>>, vector<16x8xf32>
    "tpu.trace_start"() <{level = 10 : i32, message = "qd,kd->qk"}> : () -> ()
    %cst_40 = arith.constant dense<0.000000e+00> : vector<16x16xf32>
    %56 = tpu.matmul %53, %54, %cst_40 {dimension_numbers = #tpu.dot_dimension_numbers<[1], [1], [0], [0], [0, 0, 1, 0], [], []>} : vector<16x8xf32>, vector<16x8xf32>, vector<16x16xf32> -> vector<16x16xf32>
    "tpu.trace_stop"() : () -> ()
    %57 = vector.broadcast %1 : vector<1x16xf32> to vector<16x16xf32>
    %58 = arith.addf %56, %57 : vector<16x16xf32>
    %cst_41 = arith.constant dense<0xFF800000> : vector<16xf32>
    %59 = vector.multi_reduction <maximumf>, %58, %cst_41 [1] : vector<16x16xf32> to vector<16xf32>
    %60 = vector.shape_cast %59 : vector<16xf32> to vector<16x1xf32>
    %61 = vector.broadcast %60 : vector<16x1xf32> to vector<16x16xf32>
    %62 = arith.subf %58, %61 : vector<16x16xf32>
    %63 = math.exp %62 : vector<16x16xf32>
    %cst_42 = arith.constant dense<0.000000e+00> : vector<16xf32>
    %64 = vector.multi_reduction <add>, %63, %cst_42 [1] : vector<16x16xf32> to vector<16xf32>
    %65 = vector.shape_cast %64 : vector<16xf32> to vector<16x1xf32>
    %cst_43 = arith.constant dense<0.000000e+00> : vector<16x8xf32>
    %66 = tpu.matmul %63, %55, %cst_43 {dimension_numbers = #tpu.dot_dimension_numbers<[1], [0], [0], [1], [0, 0, 1, 1], [], []>} : vector<16x16xf32>, vector<16x8xf32>, vector<16x8xf32> -> vector<16x8xf32>
    %67 = vector.broadcast %65 : vector<16x1xf32> to vector<16x8xf32>
    %68 = arith.divf %66, %67 : vector<16x8xf32>
    %c0_44 = arith.constant 0 : index
    %c24_45 = arith.constant 24 : index
    %69 = vector.load %arg6[%c0_44, %c24_45] : memref<16x32xf32, #tpu.memory_space<vmem>>, vector<16x8xf32>
    tpu.vector_store %arg6[%c0_44, %c24_45], %68 {strides = array<i32>} : memref<16x32xf32, #tpu.memory_space<vmem>>, vector<16x8xf32>,
    return
  }
  func.func @transform_0(%arg0: i32, %arg1: i32) -> (i32, i32) {
    %c1_i32 = arith.constant 1 : i32
    %0 = arith.muli %arg0, %c1_i32 : i32
    %1 = arith.addi %0, %arg1 : i32
    %c0_i32 = arith.constant 0 : i32
    %c0_i32_0 = arith.constant 0 : i32
    return %1, %c0_i32 : i32, i32
  }
  func.func @transform_1(%arg0: i32, %arg1: i32) -> (i32, i32) {
    %c0_i32 = arith.constant 0 : i32
    %c0_i32_0 = arith.constant 0 : i32
    return %arg0, %c0_i32 : i32, i32
  }
  func.func @transform_2(%arg0: i32, %arg1: i32) -> (i32, i32) {
    %c0_i32 = arith.constant 0 : i32
    %c0_i32_0 = arith.constant 0 : i32
    return %arg0, %c0_i32 : i32, i32
  }
  func.func @transform_3(%arg0: i32, %arg1: i32) -> (i32, i32, i32) {
    %c0_i32 = arith.constant 0 : i32
    %c0_i32_0 = arith.constant 0 : i32
    %c0_i32_1 = arith.constant 0 : i32
    return %arg0, %c0_i32, %c0_i32_0 : i32, i32, i32
  }
  func.func @transform_4(%arg0: i32, %arg1: i32) -> (i32, i32) {
    %c1_i32 = arith.constant 1 : i32
    %0 = arith.muli %arg0, %c1_i32 : i32
    %1 = arith.addi %0, %arg1 : i32
    %c0_i32 = arith.constant 0 : i32
    %c0_i32_0 = arith.constant 0 : i32
    return %1, %c0_i32 : i32, i32
  }
}

module attributes {stable_mosaic.version = 11 : i64} {
  func.func @_ln_kernel(%arg0: i32, %arg1: memref<32x32xf32, #tpu.memory_space<vmem>>, %arg2: memref<1x32xf32, #tpu.memory_space<vmem>>, %arg3: memref<1x32xf32, #tpu.memory_space<vmem>>, %arg4: memref<32x32xf32, #tpu.memory_space<vmem>>) attributes {dimension_semantics = [#tpu.dimension_semantics<parallel>], iteration_bounds = array<i64: 1>, scalar_prefetch = 0 : i64, scratch_operands = 0 : i64, tpu.core_type = #tpu.core_type<tc>, window_params = [{transform_indices = @transform_0, window_bounds = array<i64: 32, 32>}, {pipeline_mode = #tpu.pipeline_mode<synchronous>, transform_indices = @transform_1, window_bounds = array<i64: 1, 32>}, {pipeline_mode = #tpu.pipeline_mode<synchronous>, transform_indices = @transform_2, window_bounds = array<i64: 1, 32>}, {transform_indices = @transform_3, window_bounds = array<i64: 32, 32>}]} {
    %c0 = arith.constant 0 : index
    %c0_0 = arith.constant 0 : index
    %0 = vector.load %arg1[%c0, %c0_0] : memref<32x32xf32, #tpu.memory_space<vmem>>, vector<32x32xf32>
    %cst = arith.constant dense<0.000000e+00> : vector<32xf32>
    %1 = vector.multi_reduction <add>, %0, %cst [1] : vector<32x32xf32> to vector<32xf32>
    %2 = vector.shape_cast %1 : vector<32xf32> to vector<32x1xf32>
    %cst_1 = arith.constant 3.200000e+01 : f32
    %3 = vector.broadcast %cst_1 : f32 to vector<32x1xf32>
    %4 = arith.divf %2, %3 : vector<32x1xf32>
    %5 = vector.broadcast %4 : vector<32x1xf32> to vector<32x32xf32>
    %6 = arith.subf %0, %5 : vector<32x32xf32>
    %7 = arith.mulf %6, %6 : vector<32x32xf32>
    %cst_2 = arith.constant dense<0.000000e+00> : vector<32xf32>
    %8 = vector.multi_reduction <add>, %7, %cst_2 [1] : vector<32x32xf32> to vector<32xf32>
    %9 = vector.shape_cast %8 : vector<32xf32> to vector<32x1xf32>
    %cst_3 = arith.constant 3.200000e+01 : f32
    %10 = vector.broadcast %cst_3 : f32 to vector<32x1xf32>
    %11 = arith.divf %9, %10 : vector<32x1xf32>
    %12 = vector.broadcast %4 : vector<32x1xf32> to vector<32x32xf32>
    %13 = arith.subf %0, %12 : vector<32x32xf32>
    %cst_4 = arith.constant 9.99999996E-13 : f32
    %14 = vector.broadcast %cst_4 : f32 to vector<32x1xf32>
    %15 = arith.addf %11, %14 : vector<32x1xf32>
    %16 = math.rsqrt %15 : vector<32x1xf32>
    %17 = vector.broadcast %16 : vector<32x1xf32> to vector<32x32xf32>
    %18 = arith.mulf %13, %17 : vector<32x32xf32>
    %c0_5 = arith.constant 0 : index
    %c0_6 = arith.constant 0 : index
    %19 = vector.load %arg2[%c0_5, %c0_6] : memref<1x32xf32, #tpu.memory_space<vmem>>, vector<1x32xf32>
    %20 = vector.broadcast %19 : vector<1x32xf32> to vector<32x32xf32>
    %21 = arith.mulf %18, %20 : vector<32x32xf32>
    %c0_7 = arith.constant 0 : index
    %c0_8 = arith.constant 0 : index
    %22 = vector.load %arg3[%c0_7, %c0_8] : memref<1x32xf32, #tpu.memory_space<vmem>>, vector<1x32xf32>
    %23 = vector.broadcast %22 : vector<1x32xf32> to vector<32x32xf32>
    %24 = arith.addf %21, %23 : vector<32x32xf32>
    %c0_9 = arith.constant 0 : index
    %c0_10 = arith.constant 0 : index
    %25 = vector.load %arg4[%c0_9, %c0_10] : memref<32x32xf32, #tpu.memory_space<vmem>>, vector<32x32xf32>
    tpu.vector_store %arg4[%c0_9, %c0_10], %24 {strides = array<i32>} : memref<32x32xf32, #tpu.memory_space<vmem>>, vector<32x32xf32>,
    return
  }
  func.func @transform_0(%arg0: i32) -> (i32, i32) {
    %c0_i32 = arith.constant 0 : i32
    %c0_i32_0 = arith.constant 0 : i32
    return %arg0, %c0_i32 : i32, i32
  }
  func.func @transform_1(%arg0: i32) -> (i32, i32) {
    %c0_i32 = arith.constant 0 : i32
    %c0_i32_0 = arith.constant 0 : i32
    %c0_i32_1 = arith.constant 0 : i32
    return %c0_i32, %c0_i32_0 : i32, i32
  }
  func.func @transform_2(%arg0: i32) -> (i32, i32) {
    %c0_i32 = arith.constant 0 : i32
    %c0_i32_0 = arith.constant 0 : i32
    %c0_i32_1 = arith.constant 0 : i32
    return %c0_i32, %c0_i32_0 : i32, i32
  }
  func.func @transform_3(%arg0: i32) -> (i32, i32) {
    %c0_i32 = arith.constant 0 : i32
    %c0_i32_0 = arith.constant 0 : i32
    return %arg0, %c0_i32 : i32, i32
  }
}

module attributes {stable_mosaic.version = 11 : i64} {
  func.func @_qkv_kernel(%arg0: i32, %arg1: memref<32x32xf32, #tpu.memory_space<vmem>>, %arg2: memref<32x96xf32, #tpu.memory_space<vmem>>, %arg3: memref<1x96xf32, #tpu.memory_space<vmem>>, %arg4: memref<32x32xf32, #tpu.memory_space<vmem>>, %arg5: memref<32x32xf32, #tpu.memory_space<vmem>>, %arg6: memref<32x32xf32, #tpu.memory_space<vmem>>) attributes {dimension_semantics = [#tpu.dimension_semantics<parallel>], iteration_bounds = array<i64: 1>, scalar_prefetch = 0 : i64, scratch_operands = 0 : i64, tpu.core_type = #tpu.core_type<tc>, window_params = [{transform_indices = @transform_0, window_bounds = array<i64: 32, 32>}, {pipeline_mode = #tpu.pipeline_mode<synchronous>, transform_indices = @transform_1, window_bounds = array<i64: 32, 96>}, {pipeline_mode = #tpu.pipeline_mode<synchronous>, transform_indices = @transform_2, window_bounds = array<i64: 1, 96>}, {transform_indices = @transform_3, window_bounds = array<i64: 32, 32>}, {transform_indices = @transform_4, window_bounds = array<i64: 32, 32>}, {transform_indices = @transform_5, window_bounds = array<i64: 32, 32>}]} {
    %c0 = arith.constant 0 : index
    %c0_0 = arith.constant 0 : index
    %0 = vector.load %arg1[%c0, %c0_0] : memref<32x32xf32, #tpu.memory_space<vmem>>, vector<32x32xf32>
    %c0_1 = arith.constant 0 : index
    %c0_2 = arith.constant 0 : index
    %1 = vector.load %arg2[%c0_1, %c0_2] : memref<32x96xf32, #tpu.memory_space<vmem>>, vector<32x96xf32>
    %cst = arith.constant dense<0.000000e+00> : vector<32x96xf32>
    %2 = tpu.matmul %0, %1, %cst {dimension_numbers = #tpu.dot_dimension_numbers<[1], [0], [0], [1], [0, 0, 1, 1], [], []>} : vector<32x32xf32>, vector<32x96xf32>, vector<32x96xf32> -> vector<32x96xf32>
    %c0_3 = arith.constant 0 : index
    %c0_4 = arith.constant 0 : index
    %3 = vector.load %arg3[%c0_3, %c0_4] : memref<1x96xf32, #tpu.memory_space<vmem>>, vector<1x96xf32>
    %4 = vector.broadcast %3 : vector<1x96xf32> to vector<32x96xf32>
    %5 = arith.addf %2, %4 : vector<32x96xf32>
    %6 = vector.extract_strided_slice %5 {offsets = [0, 0], sizes = [32, 32], strides = [1, 1]} : vector<32x96xf32> to vector<32x32xf32>
    %c0_5 = arith.constant 0 : index
    %c0_6 = arith.constant 0 : index
    %7 = vector.load %arg4[%c0_5, %c0_6] : memref<32x32xf32, #tpu.memory_space<vmem>>, vector<32x32xf32>
    tpu.vector_store %arg4[%c0_5, %c0_6], %6 {strides = array<i32>} : memref<32x32xf32, #tpu.memory_space<vmem>>, vector<32x32xf32>,
    %8 = vector.extract_strided_slice %5 {offsets = [0, 32], sizes = [32, 32], strides = [1, 1]} : vector<32x96xf32> to vector<32x32xf32>
    %c0_7 = arith.constant 0 : index
    %c0_8 = arith.constant 0 : index
    %9 = vector.load %arg5[%c0_7, %c0_8] : memref<32x32xf32, #tpu.memory_space<vmem>>, vector<32x32xf32>
    tpu.vector_store %arg5[%c0_7, %c0_8], %8 {strides = array<i32>} : memref<32x32xf32, #tpu.memory_space<vmem>>, vector<32x32xf32>,
    %10 = vector.extract_strided_slice %5 {offsets = [0, 64], sizes = [32, 32], strides = [1, 1]} : vector<32x96xf32> to vector<32x32xf32>
    %c0_9 = arith.constant 0 : index
    %c0_10 = arith.constant 0 : index
    %11 = vector.load %arg6[%c0_9, %c0_10] : memref<32x32xf32, #tpu.memory_space<vmem>>, vector<32x32xf32>
    tpu.vector_store %arg6[%c0_9, %c0_10], %10 {strides = array<i32>} : memref<32x32xf32, #tpu.memory_space<vmem>>, vector<32x32xf32>,
    return
  }
  func.func @transform_0(%arg0: i32) -> (i32, i32) {
    %c0_i32 = arith.constant 0 : i32
    %c0_i32_0 = arith.constant 0 : i32
    return %arg0, %c0_i32 : i32, i32
  }
  func.func @transform_1(%arg0: i32) -> (i32, i32) {
    %c0_i32 = arith.constant 0 : i32
    %c0_i32_0 = arith.constant 0 : i32
    %c0_i32_1 = arith.constant 0 : i32
    return %c0_i32, %c0_i32_0 : i32, i32
  }
  func.func @transform_2(%arg0: i32) -> (i32, i32) {
    %c0_i32 = arith.constant 0 : i32
    %c0_i32_0 = arith.constant 0 : i32
    %c0_i32_1 = arith.constant 0 : i32
    return %c0_i32, %c0_i32_0 : i32, i32
  }
  func.func @transform_3(%arg0: i32) -> (i32, i32) {
    %c0_i32 = arith.constant 0 : i32
    %c0_i32_0 = arith.constant 0 : i32
    return %arg0, %c0_i32 : i32, i32
  }
  func.func @transform_4(%arg0: i32) -> (i32, i32) {
    %c0_i32 = arith.constant 0 : i32
    %c0_i32_0 = arith.constant 0 : i32
    return %arg0, %c0_i32 : i32, i32
  }
  func.func @transform_5(%arg0: i32) -> (i32, i32) {
    %c0_i32 = arith.constant 0 : i32
    %c0_i32_0 = arith.constant 0 : i32
    return %arg0, %c0_i32 : i32, i32
  }
}

module attributes {stable_mosaic.version = 11 : i64} {
  func.func @_linear_res_ln_kernel(%arg0: i32, %arg1: memref<32x32xf32, #tpu.memory_space<vmem>>, %arg2: memref<32x32xf32, #tpu.memory_space<vmem>>, %arg3: memref<1x32xf32, #tpu.memory_space<vmem>>, %arg4: memref<32x32xf32, #tpu.memory_space<vmem>>, %arg5: memref<1x32xf32, #tpu.memory_space<vmem>>, %arg6: memref<1x32xf32, #tpu.memory_space<vmem>>, %arg7: memref<32x32xf32, #tpu.memory_space<vmem>>) attributes {dimension_semantics = [#tpu.dimension_semantics<parallel>], iteration_bounds = array<i64: 1>, scalar_prefetch = 0 : i64, scratch_operands = 0 : i64, tpu.core_type = #tpu.core_type<tc>, window_params = [{transform_indices = @transform_0, window_bounds = array<i64: 32, 32>}, {pipeline_mode = #tpu.pipeline_mode<synchronous>, transform_indices = @transform_1, window_bounds = array<i64: 32, 32>}, {pipeline_mode = #tpu.pipeline_mode<synchronous>, transform_indices = @transform_2, window_bounds = array<i64: 1, 32>}, {transform_indices = @transform_3, window_bounds = array<i64: 32, 32>}, {pipeline_mode = #tpu.pipeline_mode<synchronous>, transform_indices = @transform_4, window_bounds = array<i64: 1, 32>}, {pipeline_mode = #tpu.pipeline_mode<synchronous>, transform_indices = @transform_5, window_bounds = array<i64: 1, 32>}, {transform_indices = @transform_6, window_bounds = array<i64: 32, 32>}]} {
    %c0 = arith.constant 0 : index
    %c0_0 = arith.constant 0 : index
    %0 = vector.load %arg1[%c0, %c0_0] : memref<32x32xf32, #tpu.memory_space<vmem>>, vector<32x32xf32>
    %c0_1 = arith.constant 0 : index
    %c0_2 = arith.constant 0 : index
    %1 = vector.load %arg2[%c0_1, %c0_2] : memref<32x32xf32, #tpu.memory_space<vmem>>, vector<32x32xf32>
    %cst = arith.constant dense<0.000000e+00> : vector<32x32xf32>
    %2 = tpu.matmul %0, %1, %cst {dimension_numbers = #tpu.dot_dimension_numbers<[1], [0], [0], [1], [0, 0, 1, 1], [], []>} : vector<32x32xf32>, vector<32x32xf32>, vector<32x32xf32> -> vector<32x32xf32>
    %c0_3 = arith.constant 0 : index
    %c0_4 = arith.constant 0 : index
    %3 = vector.load %arg3[%c0_3, %c0_4] : memref<1x32xf32, #tpu.memory_space<vmem>>, vector<1x32xf32>
    %4 = vector.broadcast %3 : vector<1x32xf32> to vector<32x32xf32>
    %5 = arith.addf %2, %4 : vector<32x32xf32>
    %c0_5 = arith.constant 0 : index
    %c0_6 = arith.constant 0 : index
    %6 = vector.load %arg4[%c0_5, %c0_6] : memref<32x32xf32, #tpu.memory_space<vmem>>, vector<32x32xf32>
    %7 = arith.addf %5, %6 : vector<32x32xf32>
    %cst_7 = arith.constant dense<0.000000e+00> : vector<32xf32>
    %8 = vector.multi_reduction <add>, %7, %cst_7 [1] : vector<32x32xf32> to vector<32xf32>
    %9 = vector.shape_cast %8 : vector<32xf32> to vector<32x1xf32>
    %cst_8 = arith.constant 3.200000e+01 : f32
    %10 = vector.broadcast %cst_8 : f32 to vector<32x1xf32>
    %11 = arith.divf %9, %10 : vector<32x1xf32>
    %12 = vector.broadcast %11 : vector<32x1xf32> to vector<32x32xf32>
    %13 = arith.subf %7, %12 : vector<32x32xf32>
    %14 = arith.mulf %13, %13 : vector<32x32xf32>
    %cst_9 = arith.constant dense<0.000000e+00> : vector<32xf32>
    %15 = vector.multi_reduction <add>, %14, %cst_9 [1] : vector<32x32xf32> to vector<32xf32>
    %16 = vector.shape_cast %15 : vector<32xf32> to vector<32x1xf32>
    %cst_10 = arith.constant 3.200000e+01 : f32
    %17 = vector.broadcast %cst_10 : f32 to vector<32x1xf32>
    %18 = arith.divf %16, %17 : vector<32x1xf32>
    %19 = vector.broadcast %11 : vector<32x1xf32> to vector<32x32xf32>
    %20 = arith.subf %7, %19 : vector<32x32xf32>
    %cst_11 = arith.constant 9.99999996E-13 : f32
    %21 = vector.broadcast %cst_11 : f32 to vector<32x1xf32>
    %22 = arith.addf %18, %21 : vector<32x1xf32>
    %23 = math.rsqrt %22 : vector<32x1xf32>
    %24 = vector.broadcast %23 : vector<32x1xf32> to vector<32x32xf32>
    %25 = arith.mulf %20, %24 : vector<32x32xf32>
    %c0_12 = arith.constant 0 : index
    %c0_13 = arith.constant 0 : index
    %26 = vector.load %arg5[%c0_12, %c0_13] : memref<1x32xf32, #tpu.memory_space<vmem>>, vector<1x32xf32>
    %27 = vector.broadcast %26 : vector<1x32xf32> to vector<32x32xf32>
    %28 = arith.mulf %25, %27 : vector<32x32xf32>
    %c0_14 = arith.constant 0 : index
    %c0_15 = arith.constant 0 : index
    %29 = vector.load %arg6[%c0_14, %c0_15] : memref<1x32xf32, #tpu.memory_space<vmem>>, vector<1x32xf32>
    %30 = vector.broadcast %29 : vector<1x32xf32> to vector<32x32xf32>
    %31 = arith.addf %28, %30 : vector<32x32xf32>
    %c0_16 = arith.constant 0 : index
    %c0_17 = arith.constant 0 : index
    %32 = vector.load %arg7[%c0_16, %c0_17] : memref<32x32xf32, #tpu.memory_space<vmem>>, vector<32x32xf32>
    tpu.vector_store %arg7[%c0_16, %c0_17], %31 {strides = array<i32>} : memref<32x32xf32, #tpu.memory_space<vmem>>, vector<32x32xf32>,
    return
  }
  func.func @transform_0(%arg0: i32) -> (i32, i32) {
    %c0_i32 = arith.constant 0 : i32
    %c0_i32_0 = arith.constant 0 : i32
    return %arg0, %c0_i32 : i32, i32
  }
  func.func @transform_1(%arg0: i32) -> (i32, i32) {
    %c0_i32 = arith.constant 0 : i32
    %c0_i32_0 = arith.constant 0 : i32
    %c0_i32_1 = arith.constant 0 : i32
    return %c0_i32, %c0_i32_0 : i32, i32
  }
  func.func @transform_2(%arg0: i32) -> (i32, i32) {
    %c0_i32 = arith.constant 0 : i32
    %c0_i32_0 = arith.constant 0 : i32
    %c0_i32_1 = arith.constant 0 : i32
    return %c0_i32, %c0_i32_0 : i32, i32
  }
  func.func @transform_3(%arg0: i32) -> (i32, i32) {
    %c0_i32 = arith.constant 0 : i32
    %c0_i32_0 = arith.constant 0 : i32
    return %arg0, %c0_i32 : i32, i32
  }
  func.func @transform_4(%arg0: i32) -> (i32, i32) {
    %c0_i32 = arith.constant 0 : i32
    %c0_i32_0 = arith.constant 0 : i32
    %c0_i32_1 = arith.constant 0 : i32
    return %c0_i32, %c0_i32_0 : i32, i32
  }
  func.func @transform_5(%arg0: i32) -> (i32, i32) {
    %c0_i32 = arith.constant 0 : i32
    %c0_i32_0 = arith.constant 0 : i32
    %c0_i32_1 = arith.constant 0 : i32
    return %c0_i32, %c0_i32_0 : i32, i32
  }
  func.func @transform_6(%arg0: i32) -> (i32, i32) {
    %c0_i32 = arith.constant 0 : i32
    %c0_i32_0 = arith.constant 0 : i32
    return %arg0, %c0_i32 : i32, i32
  }
}

module attributes {stable_mosaic.version = 11 : i64} {
  func.func @_ffn_kernel(%arg0: i32, %arg1: memref<32x32xf32, #tpu.memory_space<vmem>>, %arg2: memref<32x64xf32, #tpu.memory_space<vmem>>, %arg3: memref<1x64xf32, #tpu.memory_space<vmem>>, %arg4: memref<64x32xf32, #tpu.memory_space<vmem>>, %arg5: memref<1x32xf32, #tpu.memory_space<vmem>>, %arg6: memref<1x32xf32, #tpu.memory_space<vmem>>, %arg7: memref<1x32xf32, #tpu.memory_space<vmem>>, %arg8: memref<32x32xf32, #tpu.memory_space<vmem>>) attributes {dimension_semantics = [#tpu.dimension_semantics<parallel>], iteration_bounds = array<i64: 1>, scalar_prefetch = 0 : i64, scratch_operands = 0 : i64, tpu.core_type = #tpu.core_type<tc>, window_params = [{transform_indices = @transform_0, window_bounds = array<i64: 32, 32>}, {pipeline_mode = #tpu.pipeline_mode<synchronous>, transform_indices = @transform_1, window_bounds = array<i64: 32, 64>}, {pipeline_mode = #tpu.pipeline_mode<synchronous>, transform_indices = @transform_2, window_bounds = array<i64: 1, 64>}, {pipeline_mode = #tpu.pipeline_mode<synchronous>, transform_indices = @transform_3, window_bounds = array<i64: 64, 32>}, {pipeline_mode = #tpu.pipeline_mode<synchronous>, transform_indices = @transform_4, window_bounds = array<i64: 1, 32>}, {pipeline_mode = #tpu.pipeline_mode<synchronous>, transform_indices = @transform_5, window_bounds = array<i64: 1, 32>}, {pipeline_mode = #tpu.pipeline_mode<synchronous>, transform_indices = @transform_6, window_bounds = array<i64: 1, 32>}, {transform_indices = @transform_7, window_bounds = array<i64: 32, 32>}]} {
    %c0 = arith.constant 0 : index
    %c0_0 = arith.constant 0 : index
    %0 = vector.load %arg1[%c0, %c0_0] : memref<32x32xf32, #tpu.memory_space<vmem>>, vector<32x32xf32>
    %c0_1 = arith.constant 0 : index
    %c0_2 = arith.constant 0 : index
    %1 = vector.load %arg2[%c0_1, %c0_2] : memref<32x64xf32, #tpu.memory_space<vmem>>, vector<32x64xf32>
    %cst = arith.constant dense<0.000000e+00> : vector<32x64xf32>
    %2 = tpu.matmul %0, %1, %cst {dimension_numbers = #tpu.dot_dimension_numbers<[1], [0], [0], [1], [0, 0, 1, 1], [], []>} : vector<32x32xf32>, vector<32x64xf32>, vector<32x64xf32> -> vector<32x64xf32>
    %c0_3 = arith.constant 0 : index
    %c0_4 = arith.constant 0 : index
    %3 = vector.load %arg3[%c0_3, %c0_4] : memref<1x64xf32, #tpu.memory_space<vmem>>, vector<1x64xf32>
    %4 = vector.broadcast %3 : vector<1x64xf32> to vector<32x64xf32>
    %5 = arith.addf %2, %4 : vector<32x64xf32>
    %6 = arith.mulf %5, %5 : vector<32x64xf32>
    %7 = arith.mulf %5, %6 : vector<32x64xf32>
    %cst_5 = arith.constant 4.471500e-02 : f32
    %8 = vector.broadcast %cst_5 : f32 to vector<32x64xf32>
    %9 = arith.mulf %8, %7 : vector<32x64xf32>
    %10 = arith.addf %5, %9 : vector<32x64xf32>
    %cst_6 = arith.constant 0.797884583 : f32
    %11 = vector.broadcast %cst_6 : f32 to vector<32x64xf32>
    %12 = arith.mulf %11, %10 : vector<32x64xf32>
    %13 = math.tanh %12 : vector<32x64xf32>
    %cst_7 = arith.constant 1.000000e+00 : f32
    %14 = vector.broadcast %cst_7 : f32 to vector<32x64xf32>
    %15 = arith.addf %14, %13 : vector<32x64xf32>
    %cst_8 = arith.constant 5.000000e-01 : f32
    %16 = vector.broadcast %cst_8 : f32 to vector<32x64xf32>
    %17 = arith.mulf %16, %15 : vector<32x64xf32>
    %18 = arith.mulf %5, %17 : vector<32x64xf32>
    %c0_9 = arith.constant 0 : index
    %c0_10 = arith.constant 0 : index
    %19 = vector.load %arg4[%c0_9, %c0_10] : memref<64x32xf32, #tpu.memory_space<vmem>>, vector<64x32xf32>
    %cst_11 = arith.constant dense<0.000000e+00> : vector<32x32xf32>
    %20 = tpu.matmul %18, %19, %cst_11 {dimension_numbers = #tpu.dot_dimension_numbers<[1], [0], [0], [1], [0, 0, 1, 1], [], []>} : vector<32x64xf32>, vector<64x32xf32>, vector<32x32xf32> -> vector<32x32xf32>
    %c0_12 = arith.constant 0 : index
    %c0_13 = arith.constant 0 : index
    %21 = vector.load %arg5[%c0_12, %c0_13] : memref<1x32xf32, #tpu.memory_space<vmem>>, vector<1x32xf32>
    %22 = vector.broadcast %21 : vector<1x32xf32> to vector<32x32xf32>
    %23 = arith.addf %20, %22 : vector<32x32xf32>
    %24 = arith.addf %23, %0 : vector<32x32xf32>
    %cst_14 = arith.constant dense<0.000000e+00> : vector<32xf32>
    %25 = vector.multi_reduction <add>, %24, %cst_14 [1] : vector<32x32xf32> to vector<32xf32>
    %26 = vector.shape_cast %25 : vector<32xf32> to vector<32x1xf32>
    %cst_15 = arith.constant 3.200000e+01 : f32
    %27 = vector.broadcast %cst_15 : f32 to vector<32x1xf32>
    %28 = arith.divf %26, %27 : vector<32x1xf32>
    %29 = vector.broadcast %28 : vector<32x1xf32> to vector<32x32xf32>
    %30 = arith.subf %24, %29 : vector<32x32xf32>
    %31 = arith.mulf %30, %30 : vector<32x32xf32>
    %cst_16 = arith.constant dense<0.000000e+00> : vector<32xf32>
    %32 = vector.multi_reduction <add>, %31, %cst_16 [1] : vector<32x32xf32> to vector<32xf32>
    %33 = vector.shape_cast %32 : vector<32xf32> to vector<32x1xf32>
    %cst_17 = arith.constant 3.200000e+01 : f32
    %34 = vector.broadcast %cst_17 : f32 to vector<32x1xf32>
    %35 = arith.divf %33, %34 : vector<32x1xf32>
    %36 = vector.broadcast %28 : vector<32x1xf32> to vector<32x32xf32>
    %37 = arith.subf %24, %36 : vector<32x32xf32>
    %cst_18 = arith.constant 9.99999996E-13 : f32
    %38 = vector.broadcast %cst_18 : f32 to vector<32x1xf32>
    %39 = arith.addf %35, %38 : vector<32x1xf32>
    %40 = math.rsqrt %39 : vector<32x1xf32>
    %41 = vector.broadcast %40 : vector<32x1xf32> to vector<32x32xf32>
    %42 = arith.mulf %37, %41 : vector<32x32xf32>
    %c0_19 = arith.constant 0 : index
    %c0_20 = arith.constant 0 : index
    %43 = vector.load %arg6[%c0_19, %c0_20] : memref<1x32xf32, #tpu.memory_space<vmem>>, vector<1x32xf32>
    %44 = vector.broadcast %43 : vector<1x32xf32> to vector<32x32xf32>
    %45 = arith.mulf %42, %44 : vector<32x32xf32>
    %c0_21 = arith.constant 0 : index
    %c0_22 = arith.constant 0 : index
    %46 = vector.load %arg7[%c0_21, %c0_22] : memref<1x32xf32, #tpu.memory_space<vmem>>, vector<1x32xf32>
    %47 = vector.broadcast %46 : vector<1x32xf32> to vector<32x32xf32>
    %48 = arith.addf %45, %47 : vector<32x32xf32>
    %c0_23 = arith.constant 0 : index
    %c0_24 = arith.constant 0 : index
    %49 = vector.load %arg8[%c0_23, %c0_24] : memref<32x32xf32, #tpu.memory_space<vmem>>, vector<32x32xf32>
    tpu.vector_store %arg8[%c0_23, %c0_24], %48 {strides = array<i32>} : memref<32x32xf32, #tpu.memory_space<vmem>>, vector<32x32xf32>,
    return
  }
  func.func @transform_0(%arg0: i32) -> (i32, i32) {
    %c0_i32 = arith.constant 0 : i32
    %c0_i32_0 = arith.constant 0 : i32
    return %arg0, %c0_i32 : i32, i32
  }
  func.func @transform_1(%arg0: i32) -> (i32, i32) {
    %c0_i32 = arith.constant 0 : i32
    %c0_i32_0 = arith.constant 0 : i32
    %c0_i32_1 = arith.constant 0 : i32
    return %c0_i32, %c0_i32_0 : i32, i32
  }
  func.func @transform_2(%arg0: i32) -> (i32, i32) {
    %c0_i32 = arith.constant 0 : i32
    %c0_i32_0 = arith.constant 0 : i32
    %c0_i32_1 = arith.constant 0 : i32
    return %c0_i32, %c0_i32_0 : i32, i32
  }
  func.func @transform_3(%arg0: i32) -> (i32, i32) {
    %c0_i32 = arith.constant 0 : i32
    %c0_i32_0 = arith.constant 0 : i32
    %c0_i32_1 = arith.constant 0 : i32
    return %c0_i32, %c0_i32_0 : i32, i32
  }
  func.func @transform_4(%arg0: i32) -> (i32, i32) {
    %c0_i32 = arith.constant 0 : i32
    %c0_i32_0 = arith.constant 0 : i32
    %c0_i32_1 = arith.constant 0 : i32
    return %c0_i32, %c0_i32_0 : i32, i32
  }
  func.func @transform_5(%arg0: i32) -> (i32, i32) {
    %c0_i32 = arith.constant 0 : i32
    %c0_i32_0 = arith.constant 0 : i32
    %c0_i32_1 = arith.constant 0 : i32
    return %c0_i32, %c0_i32_0 : i32, i32
  }
  func.func @transform_6(%arg0: i32) -> (i32, i32) {
    %c0_i32 = arith.constant 0 : i32
    %c0_i32_0 = arith.constant 0 : i32
    %c0_i32_1 = arith.constant 0 : i32
    return %c0_i32, %c0_i32_0 : i32, i32
  }
  func.func @transform_7(%arg0: i32) -> (i32, i32) {
    %c0_i32 = arith.constant 0 : i32
    %c0_i32_0 = arith.constant 0 : i32
    return %arg0, %c0_i32 : i32, i32
  }
}

module attributes {stable_mosaic.version = 11 : i64} {
  func.func @_pool_cls_kernel(%arg0: i32, %arg1: memref<32x32xf32, #tpu.memory_space<vmem>>, %arg2: memref<2x32xf32, #tpu.memory_space<vmem>>, %arg3: memref<32x32xf32, #tpu.memory_space<vmem>>, %arg4: memref<1x32xf32, #tpu.memory_space<vmem>>, %arg5: memref<32x2xf32, #tpu.memory_space<vmem>>, %arg6: memref<1x2xf32, #tpu.memory_space<vmem>>, %arg7: memref<2x2xf32, #tpu.memory_space<vmem>>) attributes {dimension_semantics = [#tpu.dimension_semantics<arbitrary>], iteration_bounds = array<i64: 1>, scalar_prefetch = 0 : i64, scratch_operands = 0 : i64, tpu.core_type = #tpu.core_type<tc>, window_params = [{pipeline_mode = #tpu.pipeline_mode<synchronous>, transform_indices = @transform_0, window_bounds = array<i64: 32, 32>}, {pipeline_mode = #tpu.pipeline_mode<synchronous>, transform_indices = @transform_1, window_bounds = array<i64: 2, 32>}, {pipeline_mode = #tpu.pipeline_mode<synchronous>, transform_indices = @transform_2, window_bounds = array<i64: 32, 32>}, {pipeline_mode = #tpu.pipeline_mode<synchronous>, transform_indices = @transform_3, window_bounds = array<i64: 1, 32>}, {pipeline_mode = #tpu.pipeline_mode<synchronous>, transform_indices = @transform_4, window_bounds = array<i64: 32, 2>}, {pipeline_mode = #tpu.pipeline_mode<synchronous>, transform_indices = @transform_5, window_bounds = array<i64: 1, 2>}, {pipeline_mode = #tpu.pipeline_mode<synchronous>, transform_indices = @transform_6, window_bounds = array<i64: 2, 2>}]} {
    %c0 = arith.constant 0 : index
    %c0_0 = arith.constant 0 : index
    %0 = vector.load %arg2[%c0, %c0_0] : memref<2x32xf32, #tpu.memory_space<vmem>>, vector<2x32xf32>
    %c0_1 = arith.constant 0 : index
    %c0_2 = arith.constant 0 : index
    %1 = vector.load %arg1[%c0_1, %c0_2] : memref<32x32xf32, #tpu.memory_space<vmem>>, vector<32x32xf32>
    %cst = arith.constant dense<0.000000e+00> : vector<2x32xf32>
    %2 = tpu.matmul %0, %1, %cst {dimension_numbers = #tpu.dot_dimension_numbers<[1], [0], [0], [1], [0, 0, 1, 1], [], []>} : vector<2x32xf32>, vector<32x32xf32>, vector<2x32xf32> -> vector<2x32xf32>
    %c0_3 = arith.constant 0 : index
    %c0_4 = arith.constant 0 : index
    %3 = vector.load %arg3[%c0_3, %c0_4] : memref<32x32xf32, #tpu.memory_space<vmem>>, vector<32x32xf32>
    %cst_5 = arith.constant dense<0.000000e+00> : vector<2x32xf32>
    %4 = tpu.matmul %2, %3, %cst_5 {dimension_numbers = #tpu.dot_dimension_numbers<[1], [0], [0], [1], [0, 0, 1, 1], [], []>} : vector<2x32xf32>, vector<32x32xf32>, vector<2x32xf32> -> vector<2x32xf32>
    %c0_6 = arith.constant 0 : index
    %c0_7 = arith.constant 0 : index
    %5 = vector.load %arg4[%c0_6, %c0_7] : memref<1x32xf32, #tpu.memory_space<vmem>>, vector<1x32xf32>
    %6 = vector.broadcast %5 : vector<1x32xf32> to vector<2x32xf32>
    %7 = arith.addf %4, %6 : vector<2x32xf32>
    %8 = math.tanh %7 : vector<2x32xf32>
    %c0_8 = arith.constant 0 : index
    %c0_9 = arith.constant 0 : index
    %9 = vector.load %arg5[%c0_8, %c0_9] : memref<32x2xf32, #tpu.memory_space<vmem>>, vector<32x2xf32>
    %cst_10 = arith.constant dense<0.000000e+00> : vector<2x2xf32>
    %10 = tpu.matmul %8, %9, %cst_10 {dimension_numbers = #tpu.dot_dimension_numbers<[1], [0], [0], [1], [0, 0, 1, 1], [], []>} : vector<2x32xf32>, vector<32x2xf32>, vector<2x2xf32> -> vector<2x2xf32>
    %c0_11 = arith.constant 0 : index
    %c0_12 = arith.constant 0 : index
    %11 = vector.load %arg6[%c0_11, %c0_12] : memref<1x2xf32, #tpu.memory_space<vmem>>, vector<1x2xf32>
    %12 = vector.broadcast %11 : vector<1x2xf32> to vector<2x2xf32>
    %13 = arith.addf %10, %12 : vector<2x2xf32>
    %c0_13 = arith.constant 0 : index
    %c0_14 = arith.constant 0 : index
    %14 = vector.load %arg7[%c0_13, %c0_14] : memref<2x2xf32, #tpu.memory_space<vmem>>, vector<2x2xf32>
    tpu.vector_store %arg7[%c0_13, %c0_14], %13 {strides = array<i32>} : memref<2x2xf32, #tpu.memory_space<vmem>>, vector<2x2xf32>,
    return
  }
  func.func @transform_0(%arg0: i32) -> (i32, i32) {
    %c0_i32 = arith.constant 0 : i32
    %c0_i32_0 = arith.constant 0 : i32
    %c0_i32_1 = arith.constant 0 : i32
    return %c0_i32, %c0_i32_0 : i32, i32
  }
  func.func @transform_1(%arg0: i32) -> (i32, i32) {
    %c0_i32 = arith.constant 0 : i32
    %c0_i32_0 = arith.constant 0 : i32
    %c0_i32_1 = arith.constant 0 : i32
    return %c0_i32, %c0_i32_0 : i32, i32
  }
  func.func @transform_2(%arg0: i32) -> (i32, i32) {
    %c0_i32 = arith.constant 0 : i32
    %c0_i32_0 = arith.constant 0 : i32
    %c0_i32_1 = arith.constant 0 : i32
    return %c0_i32, %c0_i32_0 : i32, i32
  }
  func.func @transform_3(%arg0: i32) -> (i32, i32) {
    %c0_i32 = arith.constant 0 : i32
    %c0_i32_0 = arith.constant 0 : i32
    %c0_i32_1 = arith.constant 0 : i32
    return %c0_i32, %c0_i32_0 : i32, i32
  }
  func.func @transform_4(%arg0: i32) -> (i32, i32) {
    %c0_i32 = arith.constant 0 : i32
    %c0_i32_0 = arith.constant 0 : i32
    %c0_i32_1 = arith.constant 0 : i32
    return %c0_i32, %c0_i32_0 : i32, i32
  }
  func.func @transform_5(%arg0: i32) -> (i32, i32) {
    %c0_i32 = arith.constant 0 : i32
    %c0_i32_0 = arith.constant 0 : i32
    %c0_i32_1 = arith.constant 0 : i32
    return %c0_i32, %c0_i32_0 : i32, i32
  }
  func.func @transform_6(%arg0: i32) -> (i32, i32) {
    %c0_i32 = arith.constant 0 : i32
    %c0_i32_0 = arith.constant 0 : i32
    %c0_i32_1 = arith.constant 0 : i32
    return %c0_i32, %c0_i32_0 : i32, i32
  }
}

</mosaic_0001>

<bundles_post_ra>
// kernel: tpu_custom_call.1
= control target key start
LH: loop header
LB: loop body
LE: loop exit
PB: predicated region body
PF: predicated region fallthrough
CT: control target
= control target key end

     0   :  { %6 = vsyncpa [#allocation3], 0  ;;  %s102_s0 = inlined_call_operand.hbm [shape: f32[8,128], index: 0, kind: input, shape index: {}]   ;;  %s103_s1 = inlined_call_operand.hbm [shape: f32[8,128], index: 1, kind: output, shape index: {}]  }
   0x1   :  { %7 = vsyncpa [#allocation4], 0  ;;  %s84_s6 = smov [#allocation2]  }
   0x2   :  { %s14_s7 = sshll.u32 %s84_s6, 4  ;;  %s15_s7 = int_to_ptr.vmem [resolvable:$true] %s14_s7 }
   0x3   :  { %s48_s8 = scalar_lea.vmem %s15_s7, 128  ;;  %p53_p1 = scmp.lt.s32.totalorder %s15_s7, %s15_s7 }
   0x4   :  { %p49_p0 = scmp.ne.s32.totalorder %s15_s7, %s48_s8  ;;  %p54_p2 = scmp.lt.s32.totalorder %s48_s8, %s48_s8 }
   0x6   :  { %p55_p3 = por %p54_p2, %p53_p1 }
   0x8   :  { %p56_p4 = pnand %p55_p3, %p49_p0 }
   0xa   :  { %59 = shalt.err (!%p56_p4)
}
   0xb   :  { %17 = dma.hbm_to_vmem [thread:$0]  %s102_s0, 128, %s15_s7, [#allocation3]  }
   0xc   :  { %80 = dma.done.wait [#allocation3], 128  }
   0xd   :  { %81 = vsyncadd [#allocation3], 4294967168  ;;  %s85_s11 = smov [#allocation5]   ;;  %v21_v0 = vld [vmem:[#allocation2] sm:$0xff] }
   0xe   :  { %s29_s12 = sshll.u32 %s85_s11, 4  ;;  %22 = vst [vmem:[#allocation5] sm:$0xff] %v21_v0  ;;  %s30_s12 = int_to_ptr.vmem [resolvable:$true] %s29_s12 }
   0xf   :  { %s60_s13 = scalar_lea.vmem %s30_s12, 128  ;;  %p65_p6 = scmp.lt.s32.totalorder %s30_s12, %s30_s12 }
  0x10   :  { %p61_p5 = scmp.ne.s32.totalorder %s30_s12, %s60_s13  ;;  %p66_p7 = scmp.lt.s32.totalorder %s60_s13, %s60_s13 }
  0x12   :  { %p67_p8 = por %p66_p7, %p65_p6 }
  0x14   :  { %p68_p9 = pnand %p67_p8, %p61_p5 }
  0x16   :  { %71 = shalt.err (!%p68_p9)
}
  0x17   :  { %32 = dma.vmem_to_hbm [thread:$0]  %s30_s12, 128, %s103_s1, [#allocation4]  }
  0x18   :  { %82 = dma.done.wait [#allocation4], 128  }
  0x19   :  { %83 = vsyncadd [#allocation4], 4294967168 }
  0x1a   :  { %36 = vsyncpa [#allocation3], 1 }
  0x1b   :  { %37 = vsyncpa [#allocation4], 1 }

// kernel: triple_selector_forward.10
= control target key start
LH: loop header
LB: loop body
LE: loop exit
PB: predicated region body
PF: predicated region fallthrough
CT: control target
= control target key end

     0   :  { %vm18_vm0 = vcmask 261120   ;;  %s174_s0 = inlined_call_operand.vmem [shape: f32[32,32], index: 0, kind: input, shape index: {}]   ;;  %s175_s1 = inlined_call_operand.vmem [shape: f32[1,32], index: 1, kind: input, shape index: {}]   ;;  %s176_s2 = inlined_call_operand.vmem [shape: f32[1,32], index: 2, kind: input, shape index: {}]   ;;  %s177_s3 = inlined_call_operand.vmem [shape: f32[32,32], index: 3, kind: output, shape index: {}]  }
   0x1   :  { %v14_v0 = vld [vmem:[%s174_s0] sm:$0xff]  ;;  %v16_v1 = vld [vmem:[%s174_s0 + $0x10] sm:$0xff]  ;;  %v15_v2 = vld [vmem:[%s174_s0 + $0x8] sm:$0xff] }
   0x2   :  { %v19_v3 = vsel %vm18_vm0, %v14_v0, 0.0  ;;  %v25_v4 = vsel %vm18_vm0, %v16_v1, 0.0  ;;  %v17_v5 = vld [vmem:[%s174_s0 + $0x18] sm:$0xff]  ;;  %v22_v6 = vsel %vm18_vm0, %v15_v2, 0.0  ;;  %v102_v41 = vld [vmem:[%s175_s1] ss:$0 sm:$0xff] }
   0x3   :  { %20 = vadd.xlane.f32.xlu0 %v19_v3  ;;  %26 = vadd.xlane.f32.xlu1 %v25_v4  ;;  %v28_v7 = vsel %vm18_vm0, %v17_v5, 0.0  ;;  %v103_v43 = vld [vmem:[%s176_s2] ss:$0 sm:$0xff] }
   0x7   :  { %23 = vadd.xlane.f32.xlu0 %v22_v6  ;;  %29 = vadd.xlane.f32.xlu1 %v28_v7 }
  0x8c   :  { %v21_v8 = vpop.xlane.xlu0 %20  ;;  %v27_v9 = vpop.xlane.xlu1 %26 }
  0x8d   :  { %v32_v10 = vmul.f32 0.03125, %v21_v8  ;;  %v34_v11 = vmul.f32 0.03125, %v27_v9 }
  0x8f   :  { %v36_v12 = vsub.f32 %v14_v0, %v32_v10  ;;  %v38_v13 = vsub.f32 %v16_v1, %v34_v11 }
  0x90   :  { %v24_v14 = vpop.xlane.xlu0 %23  ;;  %v30_v15 = vpop.xlane.xlu1 %29 }
  0x91   :  { %v33_v16 = vmul.f32 0.03125, %v24_v14  ;;  %v35_v17 = vmul.f32 0.03125, %v30_v15  ;;  %v40_v18 = vmul.f32 %v36_v12, %v36_v12  ;;  %v42_v19 = vmul.f32 %v38_v13, %v38_v13 }
  0x93   :  { %v37_v20 = vsub.f32 %v15_v2, %v33_v16  ;;  %v39_v21 = vsub.f32 %v17_v5, %v35_v17  ;;  %v44_v22 = vsel %vm18_vm0, %v40_v18, 0.0  ;;  %v50_v23 = vsel %vm18_vm0, %v42_v19, 0.0 }
  0x94   :  { %45 = vadd.xlane.f32.xlu0 %v44_v22 }
  0x95   :  { %v41_v24 = vmul.f32 %v37_v20, %v37_v20  ;;  %v43_v25 = vmul.f32 %v39_v21, %v39_v21 }
  0x97   :  { %v47_v26 = vsel %vm18_vm0, %v41_v24, 0.0  ;;  %v53_v27 = vsel %vm18_vm0, %v43_v25, 0.0 }
  0x98   :  { %51 = vadd.xlane.f32.xlu0 %v50_v23  ;;  %48 = vadd.xlane.f32.xlu1 %v47_v26 }
  0x9c   :  { %54 = vadd.xlane.f32.xlu1 %v53_v27 }
 0x11d   :  { %v46_v28 = vpop.xlane.xlu0 %45 }
 0x11e   :  { %v56_v29 = vmul.f32 0.03125, %v46_v28 }
 0x120   :  { %v60_v30 = vadd.f32 1e-12, %v56_v29 }
 0x121   :  { %v49_v31 = vpop.xlane.xlu1 %48  ;;  %v52_v32 = vpop.xlane.xlu0 %51 }
 0x122   :  { %104 = vrsqrt.f32 %v60_v30  ;;  %v57_v33 = vmul.f32 0.03125, %v49_v31  ;;  %v58_v34 = vmul.f32 0.03125, %v52_v32 }
 0x124   :  { %v61_v35 = vadd.f32 1e-12, %v57_v33  ;;  %v62_v36 = vadd.f32 1e-12, %v58_v34 }
 0x125   :  { %v55_v37 = vpop.xlane.xlu1 %54 }
 0x126   :  { %106 = vrsqrt.f32 %v61_v35  ;;  %v59_v38 = vmul.f32 0.03125, %v55_v37 }
 0x127   :  { %108 = vrsqrt.f32 %v62_v36 }
 0x128   :  { %v63_v39 = vadd.f32 1e-12, %v59_v38 }
 0x12a   :  { %110 = vrsqrt.f32 %v63_v39 }
 0x12f   :  { %v105_v40 = vpop.eup %104 }
 0x130   :  { %v68_v42 = vmul.f32 %v105_v40, %v36_v12 }
 0x132   :  { %v79_v44 = vmul.f32 %v102_v41, %v68_v42 }
 0x133   :  { %v107_v45 = vpop.eup %106 }
 0x134   :  { %v109_v46 = vpop.eup %108  ;;  %v90_v47 = vadd.f32 %v103_v43, %v79_v44  ;;  %v69_v48 = vmul.f32 %v107_v45, %v37_v20 }
 0x135   :  { %v70_v49 = vmul.f32 %v109_v46, %v38_v13 }
 0x136   :  { %94 = vst.msk [vmem:[%s177_s3] sm:$0xff] %vm18_vm0, %v90_v47  ;;  %v80_v50 = vmul.f32 %v102_v41, %v69_v48 }
 0x137   :  { %v111_v51 = vpop.eup %110  ;;  %v81_v52 = vmul.f32 %v102_v41, %v70_v49 }
 0x138   :  { %v91_v53 = vadd.f32 %v103_v43, %v80_v50  ;;  %v71_v54 = vmul.f32 %v111_v51, %v39_v21 }
 0x139   :  { %v92_v55 = vadd.f32 %v103_v43, %v81_v52 }
 0x13a   :  { %95 = vst.msk [vmem:[%s177_s3 + $0x8] sm:$0xff] %vm18_vm0, %v91_v53  ;;  %v82_v56 = vmul.f32 %v102_v41, %v71_v54 }
 0x13b   :  { %96 = vst.msk [vmem:[%s177_s3 + $0x10] sm:$0xff] %vm18_vm0, %v92_v55 }
 0x13c   :  { %v93_v57 = vadd.f32 %v103_v43, %v82_v56 }
 0x13e   :  { %97 = vst.msk [vmem:[%s177_s3 + $0x18] sm:$0xff] %vm18_vm0, %v93_v57 }

// kernel: triple_selector_forward.11
= control target key start
LH: loop header
LB: loop body
LE: loop exit
PB: predicated region body
PF: predicated region fallthrough
CT: control target
= control target key end

     0   :  { %vm32_vm0 = vcmask 261120   ;;  %s219_s13 = smov 96   ;;  %s220_s17 = smov 64   ;;  %s330_s1 = inlined_call_operand.vmem [shape: f32[32,96], index: 1, kind: input, shape index: {}]   ;;  %s331_s0 = inlined_call_operand.vmem [shape: f32[32,32], index: 0, kind: input, shape index: {}]   ;;  %s332_s2 = inlined_call_operand.vmem [shape: f32[1,96], index: 2, kind: input, shape index: {}]   ;;  %s333_s3 = inlined_call_operand.vmem [shape: f32[32,32], index: 3, kind: output, shape index: {0}]   ;;  %s334_s4 = inlined_call_operand.vmem [shape: f32[32,32], index: 4, kind: output, shape index: {1}]   ;;  %s335_s5 = inlined_call_operand.vmem [shape: f32[32,32], index: 5, kind: output, shape index: {2}]  }
   0x1   :  { %v24_v0 = vld [vmem:[%s330_s1 + $0x18] sm:$0xff]  ;;  %v23_v1 = vld [vmem:[%s330_s1 + $0x10] sm:$0xff]  ;;  %v22_v2 = vld [vmem:[%s330_s1 + $0x8] sm:$0xff] }
   0x2   :  { %195 = vmatprep.subr.mxu0 %v24_v0  ;;  %209 = vmatprep.subr.mxu1 %v24_v0  ;;  %v21_v3 = vld [vmem:[%s330_s1] sm:$0xff]  ;;  %v19_v5 = vld [vmem:[%s331_s0 + $0x10] sm:$0xff]  ;;  %v18_v6 = vld [vmem:[%s331_s0 + $0x8] sm:$0xff] }
   0x3   :  { %196 = vmatpush3.msra.mxu0 %v24_v0  ;;  %213 = vmatpush3.msra.mxu1 %v24_v0  ;;  %v17_v4 = vld [vmem:[%s331_s0] sm:$0xff]  ;;  %v20_v7 = vld [vmem:[%s331_s0 + $0x18] sm:$0xff] }
   0x4   :  { %197 = vmatprep.subr.mxu0 %v23_v1  ;;  %210 = vmatprep.subr.mxu1 %v23_v1  ;;  %v182_v8 = vld [vmem:[%s332_s2] ss:$0 sm:$0xff] }
   0x5   :  { %198 = vmatpush3.msra.mxu0 %v23_v1  ;;  %214 = vmatpush3.msra.mxu1 %v23_v1 }
   0x6   :  { %199 = vmatprep.subr.mxu0 %v22_v2  ;;  %211 = vmatprep.subr.mxu1 %v22_v2 }
   0x7   :  { %200 = vmatpush3.msra.mxu0 %v22_v2  ;;  %215 = vmatpush3.msra.mxu1 %v22_v2 }
   0x8   :  { %201 = vmatprep.subr.mxu0 %v21_v3  ;;  %212 = vmatprep.subr.mxu1 %v21_v3 }
   0x9   :  { %202 = vmatpush3.msra.mxu0 %v21_v3  ;;  %216 = vmatpush3.msra.mxu1 %v21_v3 }
   0xa   :  { %203 = vmatprep.mubr.msk.f32.mxu0 %vm32_vm0, %v17_v4  ;;  %206 = vmatprep.mubr.msk.f32.mxu1 %vm32_vm0, %v19_v5 }
   0xb   :  { %204 = vmatmul.mubr.msk.f32.vlgmr.msra.gmra.mxu0 %vm32_vm0, %v18_v6  ;;  %207 = vmatmul.mubr.msk.f32.vlgmr.msra.gmra.mxu1 %vm32_vm0, %v20_v7 }
  0xcb   :  { %v205_v9 = vpop.f32.mrf.mxu0  ;;  %v208_v10 = vpop.f32.mrf.mxu1 }
  0xcc   :  { %v117_v11 = vadd.f32 %v205_v9, %v182_v8  ;;  %v127_v12 = vadd.f32 %v208_v10, %v182_v8 }
  0xcd   :  { %v111_v13 = vpop.f32.mrf.mxu0  ;;  %v121_v14 = vpop.f32.mrf.mxu1 }
  0xce   :  { %131 = vst.msk [vmem:[%s333_s3 + $0x8] sm:$0xff] %vm32_vm0, %v117_v11  ;;  %133 = vst.msk [vmem:[%s333_s3 + $0x18] sm:$0xff] %vm32_vm0, %v127_v12  ;;  %v112_v15 = vadd.f32 %v182_v8, %v111_v13  ;;  %v122_v16 = vadd.f32 %v182_v8, %v121_v14  ;;  %144 = vrot.lane.b32.xlu1 %v127_v12, %s219_s13  ;;  %140 = vrot.lane.b32.xlu0 %v117_v11, %s219_s13 }
  0xd0   :  { %130 = vst.msk [vmem:[%s333_s3] sm:$0xff] %vm32_vm0, %v112_v15  ;;  %132 = vst.msk [vmem:[%s333_s3 + $0x10] sm:$0xff] %vm32_vm0, %v122_v16 }
  0xd2   :  { %156 = vrot.lane.b32.xlu1 %v117_v11, %s220_s17  ;;  %138 = vrot.lane.b32.xlu0 %v112_v15, %s219_s13 }
  0xd6   :  { %142 = vrot.lane.b32.xlu1 %v122_v16, %s219_s13  ;;  %154 = vrot.lane.b32.xlu0 %v112_v15, %s220_s17 }
  0xda   :  { %160 = vrot.lane.b32.xlu1 %v127_v12, %s220_s17  ;;  %158 = vrot.lane.b32.xlu0 %v122_v16, %s220_s17 }
 0x140   :  { %v145_v17 = vpop.permute.xlu1 %144  ;;  %v141_v18 = vpop.permute.xlu0 %140 }
 0x141   :  { %153 = vst.msk [vmem:[%s334_s4 + $0x18] sm:$0xff] %vm32_vm0, %v145_v17  ;;  %151 = vst.msk [vmem:[%s334_s4 + $0x8] sm:$0xff] %vm32_vm0, %v141_v18 }
 0x144   :  { %v157_v19 = vpop.permute.xlu1 %156  ;;  %v139_v20 = vpop.permute.xlu0 %138 }
 0x145   :  { %167 = vst.msk [vmem:[%s335_s5 + $0x8] sm:$0xff] %vm32_vm0, %v157_v19  ;;  %150 = vst.msk [vmem:[%s334_s4] sm:$0xff] %vm32_vm0, %v139_v20 }
 0x148   :  { %v143_v21 = vpop.permute.xlu1 %142  ;;  %v155_v22 = vpop.permute.xlu0 %154 }
 0x149   :  { %152 = vst.msk [vmem:[%s334_s4 + $0x10] sm:$0xff] %vm32_vm0, %v143_v21  ;;  %166 = vst.msk [vmem:[%s335_s5] sm:$0xff] %vm32_vm0, %v155_v22 }
 0x14c   :  { %v161_v23 = vpop.permute.xlu1 %160  ;;  %v159_v24 = vpop.permute.xlu0 %158 }
 0x14d   :  { %169 = vst.msk [vmem:[%s335_s5 + $0x18] sm:$0xff] %vm32_vm0, %v161_v23  ;;  %168 = vst.msk [vmem:[%s335_s5 + $0x10] sm:$0xff] %vm32_vm0, %v159_v24 }

// kernel: triple_selector_forward.12
= control target key start
LH: loop header
LB: loop body
LE: loop exit
PB: predicated region body
PF: predicated region fallthrough
CT: control target
= control target key end

     0   :  { %s1505_s15 = smov 0   ;;  %s1507_s16 = smov 0   ;;  %s1707_s0 = inlined_call_operand.vmem [shape: f32[32,32], index: 0, kind: input, shape index: {}]   ;;  %s1708_s1 = inlined_call_operand.vmem [shape: f32[32,32], index: 1, kind: input, shape index: {}]   ;;  %s1709_s2 = inlined_call_operand.vmem [shape: f32[32,32], index: 2, kind: input, shape index: {}]   ;;  %s1710_s3 = inlined_call_operand.vmem [shape: f32[2,1,16], index: 3, kind: input, shape index: {}]   ;;  %s1711_s4 = inlined_call_operand.vmem [shape: f32[32,32], index: 4, kind: output, shape index: {}]  }
   0x1   :  { %s1509_s17 = smov 0  }
   0x2 LB: > { %s26_s18 = sadd.s32 1, %s1468_s16  ;;  %p1264_p0 = scmp.ge.s32.totalorder %s1472_s17, 1  ;;  %s1472_s17 = sphi %s1509_s17, %s14_s17   ;;  %s1468_s16 = sphi %s1507_s16, %s1713_s16   ;;  %s1464_s15 = sphi %s1505_s15, %s1712_s15  }
   0x3   : > { %p28_p1 = scmp.ge.s32.totalorder %s26_s18, 2  ;;  %p211_p2 = scmp.lt.s32.totalorder %s1472_s17, 3 }
   0x5   : > { %s1715_s18 = smov (%p28_p1, %s26_s18), 0  ;;  %p212_p3 = pnand %p1264_p0, %p211_p2 }
   0x6   : > { %s1265_s19 = sshll.u32 (!%p212_p3), %s1464_s15, 1  ;;  %s1474_s27 = smov (!%p212_p3), 120  }
   0x7   : > { %215 = sbr.rel (%p212_p3) target bundleno = 1784 (0x6f8), region = 36  ;;  %p254_p4 = scmp.lt.s32.totalorder (!%p212_p3), %s1265_s19, 3 }
   0x8   : > { %p272_p5 = scmp.lt.s32.totalorder (!%p212_p3), %s1464_s15, 1  ;;  %s1475_s8 = smov (!%p212_p3), 112  }
   0x9   : > { %s1476_s9 = smov (!%p212_p3), 104   ;;  %s1477_s10 = smov (!%p212_p3), 8  }
   0xa   : > { %s1478_s11 = smov (!%p212_p3), 16  }
   0xc   : > { %s1717_s19 = smov (!%p254_p4, %s1265_s19), 3  ;;  %vm296_vm0 = vcmask 64512   ;;  %s1719_s15 = smov (!%p272_p5, %s1464_s15), 1  ;;  %vm384_vm1 = vcmask 130048   ;;  %vm710_vm2 = vcmask 130112   ;;  %vm933_vm3 = vcmask 195712  }
   0xd   : > { %s1526_s20 = sshll.u32 %s1717_s19, 3  ;;  %s274_s30 = scalar_lea.vmem %s1710_s3, %s1719_s15  ;;  %vm1156_vm4 = vcmask 261312  }
   0xe   : > { %s264_s23 = scalar_lea.vmem %s1708_s1, %s1526_s20  ;;  %s257_s26 = scalar_lea.vmem %s1707_s0, %s1526_s20  ;;  %v1567_v5 = vld [vmem:[%s274_s30] ss:$0 sm:$0xff] }
   0xf   : > { %v1536_v0 = vld [vmem:[%s264_s23 + $0x8] sm:$0xff]  ;;  %v1538_v1 = vld [vmem:[%s264_s23] sm:$0xff]  ;;  %s270_s7 = scalar_lea.vmem %s1709_s2, %s1526_s20  ;;  %s280_s14 = scalar_lea.vmem %s1711_s4, %s1526_s20 }
  0x10   : > { %v1540_v2 = vld [vmem:[%s257_s26] sm:$0xff]  ;;  %1332 = vmatprep.subr.msk.mxu0 %vm296_vm0, %v1536_v0  ;;  %v1552_v3 = vld [vmem:[%s257_s26 + $0x8] sm:$0xff]  ;;  %506 = vrot.lane.b32.xlu1 %v1536_v0, %s1474_s27  ;;  %s1479_s15 = smov 24  }
  0x11   : > { %1336 = vmatprep.mubr.msk.f32.mxu0 %vm296_vm0, %v1540_v2  ;;  %1333 = vmatpush3.xpose.msk.msra.mxu0 %vm296_vm0, %v1536_v0  ;;  %v1577_v11 = vld [vmem:[%s270_s7 + $0x8] sm:$0xff]  ;;  %v1585_v12 = vld [vmem:[%s270_s7] sm:$0xff] }
  0x12   : > { %1334 = vmatprep.subr.msk.mxu0 %vm296_vm0, %v1538_v1  ;;  %1339 = vmatprep.subr.mxu1 %v1577_v11 }
  0x13   : > { %1340 = vmatpush3.msra.mxu1 %v1577_v11 }
  0x14   : > { %504 = vrot.lane.b32.xlu1 %v1538_v1, %s1474_s27  ;;  %1341 = vmatprep.subr.mxu1 %v1585_v12 }
  0x15   : > { %1335 = vmatpush3.xpose.msk.msra.mxu0 %vm296_vm0, %v1538_v1  ;;  %1342 = vmatpush3.msra.mxu1 %v1585_v12 }
  0x18   : > { %1337 = vmatmul.mubr.msk.f32.vlgmr.msra.gmra.mxu0 %vm296_vm0, %v1552_v3  ;;  %500 = vrot.lane.b32.xlu1 %v1552_v3, %s1474_s27 }
  0x1c   : > { %613 = vrot.lane.b32.xlu1 %v1577_v11, %s1474_s27 }
  0x20   : > { %729 = vrot.lane.b32.xlu1 %v1536_v0, %s1475_s8 }
  0x24   : > { %727 = vrot.lane.b32.xlu1 %v1538_v1, %s1475_s8 }
  0x82   : > { %v507_v13 = vpop.permute.xlu1 %506 }
  0x83   : > { %1346 = vmatprep.subr.msk.mxu1 %vm296_vm0, %v507_v13 }
  0x86   : > { %v505_v23 = vpop.permute.xlu1 %504 }
  0x8a   : > { %v501_v24 = vpop.permute.xlu1 %500 }
  0x8e   : > { %v614_v25 = vpop.permute.xlu1 %613 }
  0x8f   : > { %1353 = vmatprep.subr.mxu0 %v614_v25 }
  0x90   : > { %1354 = vmatpush3.msra.mxu0 %v614_v25 }
  0x92   : > { %v730_v34 = vpop.permute.xlu1 %729 }
  0x96   : > { %v728_v35 = vpop.permute.xlu1 %727 }
  0xd8   : > { %v1338_v4 = vpop.f32.mrf.mxu0 }
  0xd9   : > { %v381_v8 = vadd.f32 %v1338_v4, %v1567_v5 }
  0xda   : > { %v375_v6 = vpop.f32.mrf.mxu0 }
  0xdb   : > { %v376_v7 = vadd.f32 %v1567_v5, %v375_v6  ;;  %v388_v10 = vsel %vm384_vm1, %v381_v8, -inf }
  0xdd   : > { %v385_v9 = vsel %vm384_vm1, %v376_v7, -inf }
  0xde   : > { %386 = vmax.xlane.f32.xlu0 %v385_v9 }
  0xe2   : > { %389 = vmax.xlane.f32.xlu0 %v388_v10 }
  0xf8   : > { %498 = vrot.lane.b32.xlu0 %v1540_v2, %s1474_s27 }
 0x167   : > { %v387_v14 = vpop.xlane.xlu0 %386 }
 0x168   : > { %v391_v15 = vsub.f32 %v376_v7, %v387_v14 }
 0x16a   : > { %v393_v16 = vmul.f32 1.442695, %v391_v15 }
 0x16b   : > { %v390_v17 = vpop.xlane.xlu0 %389 }
 0x16c   : > { %1418 = vpow2.f32 %v393_v16  ;;  %v392_v18 = vsub.f32 %v381_v8, %v390_v17 }
 0x16e   : > { %v395_v19 = vmul.f32 1.442695, %v392_v18 }
 0x16f   : > { %v499_v21 = vpop.permute.xlu0 %498 }
 0x170   : > { %1420 = vpow2.f32 %v395_v19 }
 0x179   : > { %v1594_v20 = vpop.eup %1418 }
 0x17a   : > { %1343 = vmatprep.mubr.msk.f32.mxu1 %vm384_vm1, %v1594_v20 }
 0x17d   : > { %v1598_v22 = vpop.eup %1420 }
 0x17e   : > { %1344 = vmatmul.mubr.msk.f32.vlgmr.msra.gmra.mxu1 %vm384_vm1, %v1598_v22 }
 0x17f   : > { %1347 = vmatpush3.xpose.msk.msra.mxu1 %vm296_vm0, %v507_v13  ;;  %1350 = vmatprep.mubr.msk.f32.mxu1 %vm296_vm0, %v499_v21 }
 0x180   : > { %1348 = vmatprep.subr.msk.mxu1 %vm296_vm0, %v505_v23 }
 0x183   : > { %1349 = vmatpush3.xpose.msk.msra.mxu1 %vm296_vm0, %v505_v23 }
 0x186   : > { %1351 = vmatmul.mubr.msk.f32.vlgmr.msra.gmra.mxu1 %vm296_vm0, %v501_v24 }
 0x23e   : > { %v1607_v26 = vpop.f32.mrf.mxu1 }
 0x240   : > { %v1609_v27 = vpop.f32.mrf.mxu1 }
 0x246   : > { %v1352_v28 = vpop.f32.mrf.mxu1 }
 0x247   : > { %v588_v29 = vadd.f32 %v1352_v28, %v1567_v5 }
 0x248   : > { %v582_v30 = vpop.f32.mrf.mxu1 }
 0x249   : > { %v583_v31 = vadd.f32 %v1567_v5, %v582_v30  ;;  %v594_v32 = vsel %vm384_vm1, %v588_v29, -inf }
 0x24a   : > { %595 = vmax.xlane.f32.xlu0 %v594_v32 }
 0x24b   : > { %v591_v33 = vsel %vm384_vm1, %v583_v31, -inf }
 0x24c   : > { %592 = vmax.xlane.f32.xlu1 %v591_v33  ;;  %v400_v33 = vsel %vm384_vm1, %v1598_v22, 0.0 }
 0x25d   : > { %721 = vrot.lane.b32.xlu1 %v1540_v2, %s1475_s8 }
 0x260   : > { %611 = vrot.lane.b32.xlu0 %v1585_v12, %s1474_s27 }
 0x261   : > { %723 = vrot.lane.b32.xlu1 %v1552_v3, %s1475_s8 }
 0x265   : > { %834 = vrot.lane.b32.xlu1 %v1585_v12, %s1475_s8 }
 0x2d3   : > { %v596_v36 = vpop.xlane.xlu0 %595 }
 0x2d4   : > { %v598_v37 = vsub.f32 %v588_v29, %v596_v36 }
 0x2d5   : > { %v593_v38 = vpop.xlane.xlu1 %592 }
 0x2d6   : > { %v597_v39 = vsub.f32 %v583_v31, %v593_v38  ;;  %v601_v40 = vmul.f32 1.442695, %v598_v37 }
 0x2d7   : > { %v612_v41 = vpop.permute.xlu0 %611 }
 0x2d8   : > { %v599_v42 = vmul.f32 1.442695, %v597_v39  ;;  %1355 = vmatprep.subr.mxu0 %v612_v41 }
 0x2d9   : > { %1356 = vmatpush3.msra.mxu0 %v612_v41  ;;  %v722_v44 = vpop.permute.xlu1 %721 }
 0x2da   : > { %1422 = vpow2.f32 %v599_v42  ;;  %1360 = vmatprep.subr.msk.mxu0 %vm296_vm0, %v730_v34 }
 0x2db   : > { %1424 = vpow2.f32 %v601_v40 }
 0x2dd   : > { %v724_v46 = vpop.permute.xlu1 %723 }
 0x2e1   : > { %v835_v55 = vpop.permute.xlu1 %834 }
 0x2e7   : > { %v1624_v43 = vpop.eup %1422 }
 0x2e8   : > { %v1626_v45 = vpop.eup %1424  ;;  %1357 = vmatprep.mubr.msk.f32.mxu0 %vm384_vm1, %v1624_v43  ;;  %v603_v17 = vsel %vm384_vm1, %v1624_v43, 0.0 }
 0x2e9   : > { %1358 = vmatmul.mubr.msk.f32.vlgmr.msra.gmra.mxu0 %vm384_vm1, %v1626_v45  ;;  %v606_v16 = vsel %vm384_vm1, %v1626_v45, 0.0 }
 0x2ea   : > { %1361 = vmatpush3.xpose.msk.msra.mxu0 %vm296_vm0, %v730_v34  ;;  %1364 = vmatprep.mubr.msk.f32.mxu0 %vm296_vm0, %v722_v44  ;;  %v397_v34 = vsel %vm384_vm1, %v1594_v20, 0.0 }
 0x2eb   : > { %1362 = vmatprep.subr.msk.mxu0 %vm296_vm0, %v728_v35 }
 0x2ee   : > { %1363 = vmatpush3.xpose.msk.msra.mxu0 %vm296_vm0, %v728_v35 }
 0x2f1   : > { %1365 = vmatmul.mubr.msk.f32.vlgmr.msra.gmra.mxu0 %vm296_vm0, %v724_v46 }
 0x3a9   : > { %v1637_v47 = vpop.f32.mrf.mxu0 }
 0x3ab   : > { %v1639_v48 = vpop.f32.mrf.mxu0 }
 0x3b1   : > { %v1366_v49 = vpop.f32.mrf.mxu0 }
 0x3b2   : > { %v811_v50 = vadd.f32 %v1366_v49, %v1567_v5 }
 0x3b3   : > { %v805_v51 = vpop.f32.mrf.mxu0 }
 0x3b4   : > { %v806_v52 = vadd.f32 %v1567_v5, %v805_v51  ;;  %v817_v53 = vsel %vm384_vm1, %v811_v50, -inf }
 0x3b5   : > { %818 = vmax.xlane.f32.xlu0 %v817_v53 }
 0x3b6   : > { %v814_v54 = vsel %vm384_vm1, %v806_v52, -inf }
 0x3b7   : > { %815 = vmax.xlane.f32.xlu1 %v814_v54 }
 0x3c8   : > { %952 = vrot.lane.b32.xlu1 %v1536_v0, %s1476_s9 }
 0x3cb   : > { %836 = vrot.lane.b32.xlu0 %v1577_v11, %s1475_s8 }
 0x3cc   : > { %944 = vrot.lane.b32.xlu1 %v1540_v2, %s1476_s9 }
 0x3cf   : > { %950 = vrot.lane.b32.xlu0 %v1538_v1, %s1476_s9 }
 0x3d3   : > { %946 = vrot.lane.b32.xlu0 %v1552_v3, %s1476_s9 }
 0x43e   : > { %v819_v56 = vpop.xlane.xlu0 %818 }
 0x43f   : > { %v821_v57 = vsub.f32 %v811_v50, %v819_v56 }
 0x440   : > { %v816_v58 = vpop.xlane.xlu1 %815 }
 0x441   : > { %v820_v59 = vsub.f32 %v806_v52, %v816_v58  ;;  %v824_v60 = vmul.f32 1.442695, %v821_v57 }
 0x442   : > { %v837_v61 = vpop.permute.xlu0 %836 }
 0x443   : > { %v822_v62 = vmul.f32 1.442695, %v820_v59  ;;  %1367 = vmatprep.subr.mxu1 %v837_v61 }
 0x444   : > { %1368 = vmatpush3.msra.mxu1 %v837_v61  ;;  %v953_v63 = vpop.permute.xlu1 %952 }
 0x445   : > { %1426 = vpow2.f32 %v822_v62  ;;  %1369 = vmatprep.subr.mxu1 %v835_v55 }
 0x446   : > { %1428 = vpow2.f32 %v824_v60  ;;  %1370 = vmatpush3.msra.mxu1 %v835_v55  ;;  %v951_v3 = vpop.permute.xlu0 %950 }
 0x447   : > { %1374 = vmatprep.subr.msk.mxu1 %vm296_vm0, %v953_v63 }
 0x448   : > { %v945_v1 = vpop.permute.xlu1 %944 }
 0x44a   : > { %v947_v4 = vpop.permute.xlu0 %946 }
 0x452   : > { %v1427_v0 = vpop.eup %1426 }
 0x453   : > { %v1429_v2 = vpop.eup %1428  ;;  %1371 = vmatprep.mubr.msk.f32.mxu1 %vm384_vm1, %v1427_v0 }
 0x454   : > { %1372 = vmatmul.mubr.msk.f32.vlgmr.msra.gmra.mxu1 %vm384_vm1, %v1429_v2  ;;  %v829_v18 = vsel %vm384_vm1, %v1429_v2, 0.0 }
 0x455   : > { %1375 = vmatpush3.xpose.msk.msra.mxu1 %vm296_vm0, %v953_v63  ;;  %1378 = vmatprep.mubr.msk.f32.mxu1 %vm296_vm0, %v945_v1 }
 0x456   : > { %1376 = vmatprep.subr.msk.mxu1 %vm296_vm0, %v951_v3 }
 0x459   : > { %1377 = vmatpush3.xpose.msk.msra.mxu1 %vm296_vm0, %v951_v3 }
 0x45c   : > { %1379 = vmatmul.mubr.msk.f32.vlgmr.msra.gmra.mxu1 %vm296_vm0, %v947_v4 }
 0x514   : > { %v1663_v6 = vpop.f32.mrf.mxu1 }
 0x516   : > { %v912_v7 = vpop.f32.mrf.mxu1 }
 0x51c   : > { %v1380_v8 = vpop.f32.mrf.mxu1 }
 0x51d   : > { %v1034_v9 = vadd.f32 %v1380_v8, %v1567_v5 }
 0x51e   : > { %v1028_v10 = vpop.f32.mrf.mxu1 }
 0x51f   : > { %v1029_v13 = vadd.f32 %v1567_v5, %v1028_v10  ;;  %v1040_v14 = vsel %vm384_vm1, %v1034_v9, -inf  ;;  %v826_v5 = vsel %vm384_vm1, %v1427_v0, 0.0 }
 0x520   : > { %1041 = vmax.xlane.f32.xlu0 %v1040_v14 }
 0x521   : > { %v1037_v15 = vsel %vm384_vm1, %v1029_v13, -inf }
 0x522   : > { %1038 = vmax.xlane.f32.xlu1 %v1037_v15 }
 0x533   : > { %1057 = vrot.lane.b32.xlu1 %v1585_v12, %s1476_s9 }
 0x536   : > { %1059 = vrot.lane.b32.xlu0 %v1577_v11, %s1476_s9 }
 0x555   : > { %607 = vadd.xlane.f32.xlu0 %v606_v16 }
 0x557   : > { %604 = vadd.xlane.f32.xlu1 %v603_v17 }
 0x559   : > { %827 = vadd.xlane.f32.xlu0 %v826_v5 }
 0x55b   : > { %830 = vadd.xlane.f32.xlu1 %v829_v18 }
 0x5a9   : > { %v1042_v19 = vpop.xlane.xlu0 %1041 }
 0x5aa   : > { %v1044_v21 = vsub.f32 %v1034_v9, %v1042_v19 }
 0x5ab   : > { %v1039_v12 = vpop.xlane.xlu1 %1038 }
 0x5ac   : > { %v1047_v23 = vmul.f32 1.442695, %v1044_v21  ;;  %v1043_v24 = vsub.f32 %v1029_v13, %v1039_v12 }
 0x5ad   : > { %v1060_v11 = vpop.permute.xlu0 %1059 }
 0x5ae   : > { %1430 = vpow2.f32 %v1047_v23  ;;  %v1045_v25 = vmul.f32 1.442695, %v1043_v24  ;;  %1381 = vmatprep.subr.mxu0 %v1060_v11 }
 0x5af   : > { %1382 = vmatpush3.msra.mxu0 %v1060_v11  ;;  %v1058_v28 = vpop.permute.xlu1 %1057 }
 0x5b0   : > { %1432 = vpow2.f32 %v1045_v25  ;;  %1383 = vmatprep.subr.mxu0 %v1058_v28 }
 0x5b1   : > { %1384 = vmatpush3.msra.mxu0 %v1058_v28 }
 0x5bb   : > { %v1431_v29 = vpop.eup %1430 }
 0x5bc   : > { %v1052_v30 = vsel %vm384_vm1, %v1431_v29, 0.0 }
 0x5bd   : > { %v1433_v31 = vpop.eup %1432  ;;  %1053 = vadd.xlane.f32.xlu1 %v1052_v30 }
 0x5be   : > { %1385 = vmatprep.mubr.msk.f32.mxu0 %vm384_vm1, %v1433_v31  ;;  %v1049_v32 = vsel %vm384_vm1, %v1433_v31, 0.0 }
 0x5bf   : > { %1050 = vadd.xlane.f32.xlu0 %v1049_v32  ;;  %1386 = vmatmul.mubr.msk.f32.vlgmr.msra.gmra.mxu0 %vm384_vm1, %v1431_v29 }
 0x5c1   : > { %401 = vadd.xlane.f32.xlu1 %v400_v33 }
 0x5c3   : > { %398 = vadd.xlane.f32.xlu0 %v397_v34 }
 0x5de   : > { %v608_v35 = vpop.xlane.xlu0 %607 }
 0x5df   : > { %1434 = vrcp.f32 %v608_v35 }
 0x5e0   : > { %v605_v36 = vpop.xlane.xlu1 %604 }
 0x5e1   : > { %1436 = vrcp.f32 %v605_v36 }
 0x5e2   : > { %v828_v37 = vpop.xlane.xlu0 %827 }
 0x5e3   : > { %1438 = vrcp.f32 %v828_v37 }
 0x5e4   : > { %v831_v38 = vpop.xlane.xlu1 %830 }
 0x5e5   : > { %1440 = vrcp.f32 %v831_v38 }
 0x5ec   : > { %v1435_v39 = vpop.eup %1434 }
 0x5ed   : > { %v701_v40 = vmul.f32 %v1435_v39, %v1637_v47 }
 0x5ee   : > { %v1437_v41 = vpop.eup %1436 }
 0x5ef   : > { %706 = vrot.lane.b32.xlu1 %v701_v40, %s1477_s10  ;;  %v699_v22 = vmul.f32 %v1437_v41, %v1639_v48 }
 0x5f0   : > { %v1439_v42 = vpop.eup %1438 }
 0x5f1   : > { %704 = vrot.lane.b32.xlu0 %v699_v22, %s1477_s10  ;;  %v922_v20 = vmul.f32 %v1439_v42, %v912_v7 }
 0x5f2   : > { %v1441_v43 = vpop.eup %1440 }
 0x5f3   : > { %927 = vrot.lane.b32.xlu1 %v922_v20, %s1478_s11  ;;  %v924_v44 = vmul.f32 %v1441_v43, %v1663_v6 }
 0x5f5   : > { %929 = vrot.lane.b32.xlu0 %v924_v44, %s1478_s11 }
 0x646   : > { %v1054_v45 = vpop.xlane.xlu1 %1053 }
 0x648   : > { %v1051_v46 = vpop.xlane.xlu0 %1050 }
 0x64a   : > { %v402_v49 = vpop.xlane.xlu1 %401 }
 0x64b   : > { %1442 = vrcp.f32 %v402_v49 }
 0x64c   : > { %v399_v47 = vpop.xlane.xlu0 %398 }
 0x64d   : > { %1444 = vrcp.f32 %v399_v47 }
 0x64e   : > { %1446 = vrcp.f32 %v1054_v45 }
 0x64f   : > { %1448 = vrcp.f32 %v1051_v46 }
 0x658   : > { %v1443_v50 = vpop.eup %1442 }
 0x659   : > { %v487_v52 = vmul.f32 %v1443_v50, %v1607_v26 }
 0x65a   : > { %v1445_v51 = vpop.eup %1444 }
 0x65b   : > { %v485_v48 = vmul.f32 %v1445_v51, %v1609_v27  ;;  %489 = vst.msk [vmem:[%s280_s14 + $0x8] sm:$0xff] %vm296_vm0, %v487_v52  ;;  %v1447_v57 = vpop.eup %1446 }
 0x65c   : > { %v1449_v26 = vpop.eup %1448 }
 0x65d   : > { %488 = vst.msk [vmem:[%s280_s14] sm:$0xff] %vm296_vm0, %v485_v48 }
 0x661   : > { %v707_v53 = vpop.permute.xlu1 %706 }
 0x662   : > { %712 = vst.msk [vmem:[%s280_s14 + $0x8] sm:$0xff] %vm710_vm2, %v707_v53 }
 0x663   : > { %v705_v54 = vpop.permute.xlu0 %704 }
 0x664   : > { %711 = vst.msk [vmem:[%s280_s14] sm:$0xff] %vm710_vm2, %v705_v54 }
 0x665   : > { %v928_v55 = vpop.permute.xlu1 %927 }
 0x666   : > { %934 = vst.msk [vmem:[%s280_s14] sm:$0xff] %vm933_vm3, %v928_v55 }
 0x667   : > { %v930_v56 = vpop.permute.xlu0 %929 }
 0x668   : > { %935 = vst.msk [vmem:[%s280_s14 + $0x8] sm:$0xff] %vm933_vm3, %v930_v56 }
 0x67f   : > { %v1387_v27 = vpop.f32.mrf.mxu0 }
 0x680   : > { %v1147_v58 = vmul.f32 %v1447_v57, %v1387_v27 }
 0x681   : > { %v1135_v59 = vpop.f32.mrf.mxu0 }
 0x682   : > { %v1145_v60 = vmul.f32 %v1449_v26, %v1135_v59  ;;  %1152 = vrot.lane.b32.xlu0 %v1147_v58, %s1479_s15 }
 0x684   : > { %1150 = vrot.lane.b32.xlu1 %v1145_v60, %s1479_s15 }
 0x6f4   : > { %v1153_v62 = vpop.permute.xlu0 %1152 }
 0x6f5   : > { %1158 = vst.msk [vmem:[%s280_s14 + $0x8] sm:$0xff] %vm1156_vm4, %v1153_v62 }
 0x6f6   : > { %v1151_v61 = vpop.permute.xlu1 %1150 }
 0x6f7   : > { %1157 = vst.msk [vmem:[%s280_s14] sm:$0xff] %vm1156_vm4, %v1151_v61 }
 0x6f8 PF: > { %s14_s17 = sadd.s32 1, %s1472_s17   ;;  %s1712_s15 = smov %s1468_s16 }
 0x6f9   : > { %p11_p6 = scmp.ge.s32.totalorder %s14_s17, 4   ;;  %s1713_s16 = smov %s1715_s18 }
 0x6fb   :  { %13 = sbr.rel (!%p11_p6) target bundleno = 2 (0x2), region = 75 }

// kernel: triple_selector_forward.13
= control target key start
LH: loop header
LB: loop body
LE: loop exit
PB: predicated region body
PF: predicated region fallthrough
CT: control target
= control target key end

     0   :  { %vm38_vm0 = vcmask 261120   ;;  %s380_s1 = inlined_call_operand.vmem [shape: f32[32,32], index: 1, kind: input, shape index: {}]   ;;  %s381_s0 = inlined_call_operand.vmem [shape: f32[32,32], index: 0, kind: input, shape index: {}]   ;;  %s382_s2 = inlined_call_operand.vmem [shape: f32[1,32], index: 2, kind: input, shape index: {}]   ;;  %s383_s3 = inlined_call_operand.vmem [shape: f32[32,32], index: 3, kind: input, shape index: {}]   ;;  %s384_s4 = inlined_call_operand.vmem [shape: f32[1,32], index: 4, kind: input, shape index: {}]   ;;  %s385_s5 = inlined_call_operand.vmem [shape: f32[1,32], index: 5, kind: input, shape index: {}]   ;;  %s386_s6 = inlined_call_operand.vmem [shape: f32[32,32], index: 6, kind: output, shape index: {}]  }
   0x1   :  { %v30_v0 = vld [vmem:[%s380_s1 + $0x18] sm:$0xff]  ;;  %v29_v1 = vld [vmem:[%s380_s1 + $0x10] sm:$0xff]  ;;  %v28_v2 = vld [vmem:[%s380_s1 + $0x8] sm:$0xff] }
   0x2   :  { %242 = vmatprep.subr.mxu0 %v30_v0  ;;  %256 = vmatprep.subr.mxu1 %v30_v0  ;;  %v27_v3 = vld [vmem:[%s380_s1] sm:$0xff]  ;;  %v25_v5 = vld [vmem:[%s381_s0 + $0x10] sm:$0xff]  ;;  %v24_v6 = vld [vmem:[%s381_s0 + $0x8] sm:$0xff] }
   0x3   :  { %243 = vmatpush3.msra.mxu0 %v30_v0  ;;  %260 = vmatpush3.msra.mxu1 %v30_v0  ;;  %v23_v4 = vld [vmem:[%s381_s0] sm:$0xff]  ;;  %v26_v7 = vld [vmem:[%s381_s0 + $0x18] sm:$0xff]  ;;  %v138_v13 = vld [vmem:[%s383_s3 + $0x10] sm:$0xff] }
   0x4   :  { %244 = vmatprep.subr.mxu0 %v29_v1  ;;  %257 = vmatprep.subr.mxu1 %v29_v1  ;;  %v227_v9 = vld [vmem:[%s382_s2] ss:$0 sm:$0xff]  ;;  %v139_v19 = vld [vmem:[%s383_s3 + $0x18] sm:$0xff]  ;;  %v137_v20 = vld [vmem:[%s383_s3 + $0x8] sm:$0xff] }
   0x5   :  { %245 = vmatpush3.msra.mxu0 %v29_v1  ;;  %261 = vmatpush3.msra.mxu1 %v29_v1  ;;  %v136_v14 = vld [vmem:[%s383_s3] sm:$0xff] }
   0x6   :  { %246 = vmatprep.subr.mxu0 %v28_v2  ;;  %258 = vmatprep.subr.mxu1 %v28_v2  ;;  %v232_v62 = vld [vmem:[%s384_s4] ss:$0 sm:$0xff] }
   0x7   :  { %247 = vmatpush3.msra.mxu0 %v28_v2  ;;  %262 = vmatpush3.msra.mxu1 %v28_v2  ;;  %v233_v0 = vld [vmem:[%s385_s5] ss:$0 sm:$0xff] }
   0x8   :  { %248 = vmatprep.subr.mxu0 %v27_v3  ;;  %259 = vmatprep.subr.mxu1 %v27_v3 }
   0x9   :  { %249 = vmatpush3.msra.mxu0 %v27_v3  ;;  %263 = vmatpush3.msra.mxu1 %v27_v3 }
   0xa   :  { %250 = vmatprep.mubr.msk.f32.mxu0 %vm38_vm0, %v23_v4  ;;  %253 = vmatprep.mubr.msk.f32.mxu1 %vm38_vm0, %v25_v5 }
   0xb   :  { %251 = vmatmul.mubr.msk.f32.vlgmr.msra.gmra.mxu0 %vm38_vm0, %v24_v6  ;;  %254 = vmatmul.mubr.msk.f32.vlgmr.msra.gmra.mxu1 %vm38_vm0, %v26_v7 }
  0xcb   :  { %v252_v8 = vpop.f32.mrf.mxu0  ;;  %v255_v10 = vpop.f32.mrf.mxu1 }
  0xcc   :  { %v123_v15 = vadd.f32 %v252_v8, %v227_v9  ;;  %v133_v16 = vadd.f32 %v255_v10, %v227_v9 }
  0xcd   :  { %v117_v11 = vpop.f32.mrf.mxu0  ;;  %v127_v12 = vpop.f32.mrf.mxu1 }
  0xce   :  { %v118_v17 = vadd.f32 %v227_v9, %v117_v11  ;;  %v128_v18 = vadd.f32 %v227_v9, %v127_v12  ;;  %v143_v25 = vadd.f32 %v139_v19, %v133_v16  ;;  %v141_v26 = vadd.f32 %v137_v20, %v123_v15 }
  0xd0   :  { %v142_v21 = vadd.f32 %v138_v13, %v128_v18  ;;  %v140_v22 = vadd.f32 %v136_v14, %v118_v17  ;;  %v153_v27 = vsel %vm38_vm0, %v143_v25, 0.0  ;;  %v147_v28 = vsel %vm38_vm0, %v141_v26, 0.0 }
  0xd2   :  { %v150_v23 = vsel %vm38_vm0, %v142_v21, 0.0  ;;  %v144_v24 = vsel %vm38_vm0, %v140_v22, 0.0 }
  0xd3   :  { %151 = vadd.xlane.f32.xlu1 %v150_v23  ;;  %145 = vadd.xlane.f32.xlu0 %v144_v24 }
  0xd7   :  { %154 = vadd.xlane.f32.xlu1 %v153_v27  ;;  %148 = vadd.xlane.f32.xlu0 %v147_v28 }
 0x15c   :  { %v152_v29 = vpop.xlane.xlu1 %151  ;;  %v146_v30 = vpop.xlane.xlu0 %145 }
 0x15d   :  { %v159_v31 = vmul.f32 0.03125, %v152_v29  ;;  %v157_v32 = vmul.f32 0.03125, %v146_v30 }
 0x15f   :  { %v163_v33 = vsub.f32 %v142_v21, %v159_v31  ;;  %v161_v34 = vsub.f32 %v140_v22, %v157_v32 }
 0x160   :  { %v155_v35 = vpop.xlane.xlu1 %154  ;;  %v149_v36 = vpop.xlane.xlu0 %148 }
 0x161   :  { %v160_v37 = vmul.f32 0.03125, %v155_v35  ;;  %v158_v38 = vmul.f32 0.03125, %v149_v36  ;;  %v165_v39 = vmul.f32 %v161_v34, %v161_v34  ;;  %v167_v43 = vmul.f32 %v163_v33, %v163_v33 }
 0x163   :  { %v164_v40 = vsub.f32 %v143_v25, %v160_v37  ;;  %v162_v41 = vsub.f32 %v141_v26, %v158_v38  ;;  %v169_v42 = vsel %vm38_vm0, %v165_v39, 0.0  ;;  %v175_v45 = vsel %vm38_vm0, %v167_v43, 0.0 }
 0x164   :  { %170 = vadd.xlane.f32.xlu0 %v169_v42 }
 0x165   :  { %v166_v44 = vmul.f32 %v162_v41, %v162_v41  ;;  %v168_v47 = vmul.f32 %v164_v40, %v164_v40 }
 0x167   :  { %v172_v46 = vsel %vm38_vm0, %v166_v44, 0.0  ;;  %v178_v48 = vsel %vm38_vm0, %v168_v47, 0.0 }
 0x168   :  { %176 = vadd.xlane.f32.xlu0 %v175_v45  ;;  %173 = vadd.xlane.f32.xlu1 %v172_v46 }
 0x16c   :  { %179 = vadd.xlane.f32.xlu1 %v178_v48 }
 0x1ed   :  { %v171_v49 = vpop.xlane.xlu0 %170 }
 0x1ee   :  { %v181_v50 = vmul.f32 0.03125, %v171_v49 }
 0x1f0   :  { %v185_v51 = vadd.f32 1e-12, %v181_v50 }
 0x1f1   :  { %v174_v52 = vpop.xlane.xlu1 %173  ;;  %v177_v53 = vpop.xlane.xlu0 %176 }
 0x1f2   :  { %264 = vrsqrt.f32 %v185_v51  ;;  %v182_v54 = vmul.f32 0.03125, %v174_v52  ;;  %v183_v55 = vmul.f32 0.03125, %v177_v53 }
 0x1f4   :  { %v186_v56 = vadd.f32 1e-12, %v182_v54  ;;  %v187_v57 = vadd.f32 1e-12, %v183_v55 }
 0x1f5   :  { %v180_v58 = vpop.xlane.xlu1 %179 }
 0x1f6   :  { %266 = vrsqrt.f32 %v186_v56  ;;  %v184_v59 = vmul.f32 0.03125, %v180_v58 }
 0x1f7   :  { %268 = vrsqrt.f32 %v187_v57 }
 0x1f8   :  { %v188_v60 = vadd.f32 1e-12, %v184_v59 }
 0x1fa   :  { %270 = vrsqrt.f32 %v188_v60 }
 0x1ff   :  { %v265_v61 = vpop.eup %264 }
 0x200   :  { %v193_v63 = vmul.f32 %v265_v61, %v161_v34 }
 0x202   :  { %v204_v1 = vmul.f32 %v232_v62, %v193_v63 }
 0x203   :  { %v267_v2 = vpop.eup %266 }
 0x204   :  { %v269_v3 = vpop.eup %268  ;;  %v215_v4 = vadd.f32 %v233_v0, %v204_v1  ;;  %v194_v5 = vmul.f32 %v267_v2, %v162_v41 }
 0x205   :  { %v195_v6 = vmul.f32 %v269_v3, %v163_v33 }
 0x206   :  { %219 = vst.msk [vmem:[%s386_s6] sm:$0xff] %vm38_vm0, %v215_v4  ;;  %v205_v7 = vmul.f32 %v232_v62, %v194_v5 }
 0x207   :  { %v271_v8 = vpop.eup %270  ;;  %v206_v9 = vmul.f32 %v232_v62, %v195_v6 }
 0x208   :  { %v216_v10 = vadd.f32 %v233_v0, %v205_v7  ;;  %v196_v11 = vmul.f32 %v271_v8, %v164_v40 }
 0x209   :  { %v217_v12 = vadd.f32 %v233_v0, %v206_v9 }
 0x20a   :  { %220 = vst.msk [vmem:[%s386_s6 + $0x8] sm:$0xff] %vm38_vm0, %v216_v10  ;;  %v207_v13 = vmul.f32 %v232_v62, %v196_v11 }
 0x20b   :  { %221 = vst.msk [vmem:[%s386_s6 + $0x10] sm:$0xff] %vm38_vm0, %v217_v12 }
 0x20c   :  { %v218_v14 = vadd.f32 %v233_v0, %v207_v13 }
 0x20e   :  { %222 = vst.msk [vmem:[%s386_s6 + $0x18] sm:$0xff] %vm38_vm0, %v218_v14 }

// kernel: triple_selector_forward.14
= control target key start
LH: loop header
LB: loop body
LE: loop exit
PB: predicated region body
PF: predicated region fallthrough
CT: control target
= control target key end

     0   :  { %vm41_vm0 = vcmask 261120   ;;  %vm190_vm1 = vcmask 523264   ;;  %s603_s1 = inlined_call_operand.vmem [shape: f32[32,64], index: 1, kind: input, shape index: {}]   ;;  %s604_s0 = inlined_call_operand.vmem [shape: f32[32,32], index: 0, kind: input, shape index: {}]   ;;  %s605_s3 = inlined_call_operand.vmem [shape: f32[64,32], index: 3, kind: input, shape index: {}]   ;;  %s606_s2 = inlined_call_operand.vmem [shape: f32[1,64], index: 2, kind: input, shape index: {}]   ;;  %s607_s4 = inlined_call_operand.vmem [shape: f32[1,32], index: 4, kind: input, shape index: {}]   ;;  %s608_s5 = inlined_call_operand.vmem [shape: f32[1,32], index: 5, kind: input, shape index: {}]   ;;  %s609_s6 = inlined_call_operand.vmem [shape: f32[1,32], index: 6, kind: input, shape index: {}]   ;;  %s610_s7 = inlined_call_operand.vmem [shape: f32[32,32], index: 7, kind: output, shape index: {}]  }
   0x1   :  { %v33_v0 = vld [vmem:[%s603_s1 + $0x18] sm:$0xff]  ;;  %v32_v1 = vld [vmem:[%s603_s1 + $0x10] sm:$0xff]  ;;  %v508_v2 = vld [vmem:[%s604_s0] sm:$0xff] }
   0x2   :  { %407 = vmatprep.subr.mxu0 %v33_v0  ;;  %v31_v3 = vld [vmem:[%s603_s1 + $0x8] sm:$0xff]  ;;  %415 = vmatprep.mubr.msk.f32.mxu0 %vm41_vm0, %v508_v2  ;;  %v30_v4 = vld [vmem:[%s603_s1] sm:$0xff]  ;;  %v526_v6 = vld [vmem:[%s604_s0 + $0x10] sm:$0xff] }
   0x3   :  { %408 = vmatpush3.msra.mxu0 %v33_v0  ;;  %v521_v5 = vld [vmem:[%s604_s0 + $0x8] sm:$0xff]  ;;  %v535_v7 = vld [vmem:[%s604_s0 + $0x18] sm:$0xff]  ;;  %v181_v9 = vld [vmem:[%s605_s3 + $0x30] sm:$0xff] }
   0x4   :  { %409 = vmatprep.subr.mxu0 %v32_v1  ;;  %v182_v8 = vld [vmem:[%s605_s3 + $0x38] sm:$0xff]  ;;  %v180_v10 = vld [vmem:[%s605_s3 + $0x28] sm:$0xff]  ;;  %v179_v11 = vld [vmem:[%s605_s3 + $0x20] sm:$0xff] }
   0x5   :  { %410 = vmatpush3.msra.mxu0 %v32_v1  ;;  %421 = vmatprep.subr.mxu1 %v182_v8  ;;  %v178_v12 = vld [vmem:[%s605_s3 + $0x18] sm:$0xff]  ;;  %v177_v13 = vld [vmem:[%s605_s3 + $0x10] sm:$0xff]  ;;  %v176_v14 = vld [vmem:[%s605_s3 + $0x8] sm:$0xff] }
   0x6   :  { %411 = vmatprep.subr.mxu0 %v31_v3  ;;  %422 = vmatpush3.msra.mxu1 %v182_v8  ;;  %v175_v15 = vld [vmem:[%s605_s3] sm:$0xff] }
   0x7   :  { %412 = vmatpush3.msra.mxu0 %v31_v3  ;;  %423 = vmatprep.subr.mxu1 %v181_v9  ;;  %v375_v16 = vld [vmem:[%s606_s2] ss:$0 sm:$0xff] }
   0x8   :  { %413 = vmatprep.subr.mxu0 %v30_v4  ;;  %424 = vmatpush3.msra.mxu1 %v181_v9  ;;  %v380_v62 = vld [vmem:[%s607_s4] ss:$0 sm:$0xff] }
   0x9   :  { %414 = vmatpush3.msra.mxu0 %v30_v4  ;;  %425 = vmatprep.subr.mxu1 %v180_v10 }
   0xa   :  { %416 = vmatmul.mubr.msk.f32.vlgmr.msra.gmra.mxu0 %vm41_vm0, %v521_v5  ;;  %426 = vmatpush3.msra.mxu1 %v180_v10 }
   0xb   :  { %418 = vmatprep.mubr.msk.f32.mxu0 %vm41_vm0, %v526_v6  ;;  %427 = vmatprep.subr.mxu1 %v179_v11 }
   0xc   :  { %428 = vmatpush3.msra.mxu1 %v179_v11 }
   0xd   :  { %429 = vmatprep.subr.mxu1 %v178_v12 }
   0xe   :  { %419 = vmatmul.mubr.msk.f32.gmra.mxu0 %vm41_vm0, %v535_v7  ;;  %430 = vmatpush3.msra.mxu1 %v178_v12 }
   0xf   :  { %431 = vmatprep.subr.mxu1 %v177_v13 }
  0x10   :  { %432 = vmatpush3.msra.mxu1 %v177_v13 }
  0x11   :  { %433 = vmatprep.subr.mxu1 %v176_v14 }
  0x12   :  { %434 = vmatpush3.msra.mxu1 %v176_v14 }
  0x13   :  { %435 = vmatprep.subr.mxu1 %v175_v15 }
  0x14   :  { %436 = vmatpush3.msra.mxu1 %v175_v15 }
  0xca   :  { %v417_v17 = vpop.f32.mrf.mxu0 }
  0xcb   :  { %v126_v18 = vadd.f32 %v417_v17, %v375_v16 }
  0xcc   :  { %v120_v19 = vpop.f32.mrf.mxu0 }
  0xcd   :  { %v140_v20 = vmul.f32 %v126_v18, %v126_v18  ;;  %v121_v21 = vadd.f32 %v375_v16, %v120_v19 }
  0xce   :  { %v420_v22 = vpop.f32.mrf.mxu0 }
  0xcf   :  { %v144_v23 = vmul.f32 %v140_v20, %v126_v18  ;;  %v139_v24 = vmul.f32 %v121_v21, %v121_v21  ;;  %v136_v25 = vadd.f32 %v420_v22, %v375_v16 }
  0xd0   :  { %v130_v26 = vpop.f32.mrf.mxu0 }
  0xd1   :  { %v148_v27 = vmul.f32 0.044715, %v144_v23  ;;  %v143_v28 = vmul.f32 %v139_v24, %v121_v21  ;;  %v142_v29 = vmul.f32 %v136_v25, %v136_v25  ;;  %v131_v30 = vadd.f32 %v375_v16, %v130_v26 }
  0xd3   :  { %v152_v31 = vadd.f32 %v148_v27, %v126_v18  ;;  %v147_v32 = vmul.f32 0.044715, %v143_v28  ;;  %v146_v33 = vmul.f32 %v142_v29, %v136_v25  ;;  %v141_v34 = vmul.f32 %v131_v30, %v131_v30 }
  0xd5   :  { %v156_v35 = vmul.f32 0.7978846, %v152_v31  ;;  %v150_v36 = vmul.f32 0.044715, %v146_v33  ;;  %v145_v37 = vmul.f32 %v141_v34, %v131_v30  ;;  %v151_v38 = vadd.f32 %v147_v32, %v121_v21 }
  0xd7   :  { %443 = vtanh.f32 %v156_v35  ;;  %v154_v39 = vadd.f32 %v150_v36, %v136_v25  ;;  %v149_v40 = vmul.f32 0.044715, %v145_v37  ;;  %v155_v41 = vmul.f32 0.7978846, %v151_v38 }
  0xd9   :  { %v158_v42 = vmul.f32 0.7978846, %v154_v39  ;;  %v153_v43 = vadd.f32 %v149_v40, %v131_v30  ;;  %445 = vtanh.f32 %v155_v41 }
  0xdb   :  { %447 = vtanh.f32 %v158_v42  ;;  %v157_v44 = vmul.f32 0.7978846, %v153_v43 }
  0xdd   :  { %449 = vtanh.f32 %v157_v44 }
  0xe4   :  { %v444_v45 = vpop.eup %443 }
  0xe5   :  { %v164_v46 = vadd.f32 1.0, %v444_v45 }
  0xe6   :  { %v446_v47 = vpop.eup %445 }
  0xe7   :  { %v163_v48 = vadd.f32 1.0, %v446_v47  ;;  %v168_v50 = vmul.f32 0.5, %v164_v46  ;;  %v385_v47 = vld [vmem:[%s608_s5] ss:$0 sm:$0xff] }
  0xe8   :  { %v448_v49 = vpop.eup %447 }
  0xe9   :  { %v167_v51 = vmul.f32 0.5, %v163_v48  ;;  %v166_v52 = vadd.f32 1.0, %v448_v49  ;;  %v172_v56 = vmul.f32 %v168_v50, %v126_v18  ;;  %v386_v49 = vld [vmem:[%s609_s6] ss:$0 sm:$0xff] }
  0xea   :  { %v450_v53 = vpop.eup %449 }
  0xeb   :  { %v171_v54 = vmul.f32 %v167_v51, %v121_v21  ;;  %v165_v55 = vadd.f32 1.0, %v450_v53  ;;  %v170_v57 = vmul.f32 0.5, %v166_v52 }
  0xed   :  { %437 = vmatprep.mubr.msk.f32.mxu1 %vm190_vm1, %v171_v54  ;;  %v169_v58 = vmul.f32 0.5, %v165_v55  ;;  %v174_v60 = vmul.f32 %v170_v57, %v136_v25 }
  0xee   :  { %438 = vmatmul.mubr.msk.f32.vlgmr.msra.gmra.mxu1 %vm190_vm1, %v172_v56 }
  0xef   :  { %v173_v59 = vmul.f32 %v169_v58, %v131_v30 }
  0xf1   :  { %440 = vmatprep.mubr.msk.f32.mxu1 %vm190_vm1, %v173_v59 }
  0xf2   :  { %441 = vmatmul.mubr.msk.f32.gmra.mxu1 %vm190_vm1, %v174_v60 }
 0x1ae   :  { %v439_v61 = vpop.f32.mrf.mxu1 }
 0x1af   :  { %v275_v0 = vadd.f32 %v439_v61, %v380_v62 }
 0x1b0   :  { %v269_v63 = vpop.f32.mrf.mxu1 }
 0x1b1   :  { %v270_v1 = vadd.f32 %v380_v62, %v269_v63  ;;  %v289_v12 = vadd.f32 %v275_v0, %v521_v5 }
 0x1b2   :  { %v442_v3 = vpop.f32.mrf.mxu1 }
 0x1b3   :  { %v288_v4 = vadd.f32 %v270_v1, %v508_v2  ;;  %v285_v9 = vadd.f32 %v442_v3, %v380_v62  ;;  %v295_v15 = vsel %vm41_vm0, %v289_v12, 0.0 }
 0x1b4   :  { %v279_v8 = vpop.f32.mrf.mxu1 }
 0x1b5   :  { %v280_v10 = vadd.f32 %v380_v62, %v279_v8  ;;  %v292_v11 = vsel %vm41_vm0, %v288_v4, 0.0  ;;  %v291_v16 = vadd.f32 %v285_v9, %v535_v7 }
 0x1b6   :  { %293 = vadd.xlane.f32.xlu0 %v292_v11 }
 0x1b7   :  { %v290_v13 = vadd.f32 %v280_v10, %v526_v6  ;;  %v301_v2 = vsel %vm41_vm0, %v291_v16, 0.0 }
 0x1b9   :  { %v298_v14 = vsel %vm41_vm0, %v290_v13, 0.0 }
 0x1ba   :  { %299 = vadd.xlane.f32.xlu1 %v298_v14  ;;  %296 = vadd.xlane.f32.xlu0 %v295_v15 }
 0x1be   :  { %302 = vadd.xlane.f32.xlu1 %v301_v2 }
 0x23f   :  { %v294_v17 = vpop.xlane.xlu0 %293 }
 0x240   :  { %v305_v18 = vmul.f32 0.03125, %v294_v17 }
 0x242   :  { %v309_v19 = vsub.f32 %v288_v4, %v305_v18 }
 0x243   :  { %v300_v20 = vpop.xlane.xlu1 %299  ;;  %v297_v21 = vpop.xlane.xlu0 %296 }
 0x244   :  { %v307_v5 = vmul.f32 0.03125, %v300_v20  ;;  %v306_v22 = vmul.f32 0.03125, %v297_v21  ;;  %v313_v23 = vmul.f32 %v309_v19, %v309_v19 }
 0x246   :  { %v311_v6 = vsub.f32 %v290_v13, %v307_v5  ;;  %v310_v24 = vsub.f32 %v289_v12, %v306_v22  ;;  %v317_v25 = vsel %vm41_vm0, %v313_v23, 0.0 }
 0x247   :  { %v303_v26 = vpop.xlane.xlu1 %302  ;;  %318 = vadd.xlane.f32.xlu0 %v317_v25 }
 0x248   :  { %v308_v7 = vmul.f32 0.03125, %v303_v26  ;;  %v315_v27 = vmul.f32 %v311_v6, %v311_v6  ;;  %v314_v28 = vmul.f32 %v310_v24, %v310_v24 }
 0x24a   :  { %v312_v29 = vsub.f32 %v291_v16, %v308_v7  ;;  %v323_v30 = vsel %vm41_vm0, %v315_v27, 0.0  ;;  %v320_v31 = vsel %vm41_vm0, %v314_v28, 0.0 }
 0x24b   :  { %324 = vadd.xlane.f32.xlu0 %v323_v30  ;;  %321 = vadd.xlane.f32.xlu1 %v320_v31 }
 0x24c   :  { %v316_v32 = vmul.f32 %v312_v29, %v312_v29 }
 0x24e   :  { %v326_v33 = vsel %vm41_vm0, %v316_v32, 0.0 }
 0x24f   :  { %327 = vadd.xlane.f32.xlu1 %v326_v33 }
 0x2d0   :  { %v319_v34 = vpop.xlane.xlu0 %318 }
 0x2d1   :  { %v329_v35 = vmul.f32 0.03125, %v319_v34 }
 0x2d3   :  { %v333_v36 = vadd.f32 1e-12, %v329_v35 }
 0x2d4   :  { %v322_v37 = vpop.xlane.xlu1 %321  ;;  %v325_v38 = vpop.xlane.xlu0 %324 }
 0x2d5   :  { %451 = vrsqrt.f32 %v333_v36  ;;  %v330_v39 = vmul.f32 0.03125, %v322_v37  ;;  %v331_v40 = vmul.f32 0.03125, %v325_v38 }
 0x2d7   :  { %v334_v41 = vadd.f32 1e-12, %v330_v39  ;;  %v335_v42 = vadd.f32 1e-12, %v331_v40 }
 0x2d8   :  { %v328_v43 = vpop.xlane.xlu1 %327 }
 0x2d9   :  { %453 = vrsqrt.f32 %v334_v41  ;;  %v332_v44 = vmul.f32 0.03125, %v328_v43 }
 0x2da   :  { %455 = vrsqrt.f32 %v335_v42 }
 0x2db   :  { %v336_v45 = vadd.f32 1e-12, %v332_v44 }
 0x2dd   :  { %457 = vrsqrt.f32 %v336_v45 }
 0x2e2   :  { %v452_v46 = vpop.eup %451 }
 0x2e3   :  { %v341_v48 = vmul.f32 %v452_v46, %v309_v19 }
 0x2e5   :  { %v352_v50 = vmul.f32 %v385_v47, %v341_v48 }
 0x2e6   :  { %v454_v51 = vpop.eup %453 }
 0x2e7   :  { %v456_v52 = vpop.eup %455  ;;  %v363_v53 = vadd.f32 %v386_v49, %v352_v50  ;;  %v342_v54 = vmul.f32 %v454_v51, %v310_v24 }
 0x2e8   :  { %v343_v55 = vmul.f32 %v456_v52, %v311_v6 }
 0x2e9   :  { %367 = vst.msk [vmem:[%s610_s7] sm:$0xff] %vm41_vm0, %v363_v53  ;;  %v353_v56 = vmul.f32 %v385_v47, %v342_v54 }
 0x2ea   :  { %v458_v57 = vpop.eup %457  ;;  %v354_v58 = vmul.f32 %v385_v47, %v343_v55 }
 0x2eb   :  { %v364_v59 = vadd.f32 %v386_v49, %v353_v56  ;;  %v344_v60 = vmul.f32 %v458_v57, %v312_v29 }
 0x2ec   :  { %v365_v61 = vadd.f32 %v386_v49, %v354_v58 }
 0x2ed   :  { %368 = vst.msk [vmem:[%s610_s7 + $0x8] sm:$0xff] %vm41_vm0, %v364_v59  ;;  %v355_v62 = vmul.f32 %v385_v47, %v344_v60 }
 0x2ee   :  { %369 = vst.msk [vmem:[%s610_s7 + $0x10] sm:$0xff] %vm41_vm0, %v365_v61 }
 0x2ef   :  { %v366_v63 = vadd.f32 %v386_v49, %v355_v62 }
 0x2f1   :  { %370 = vst.msk [vmem:[%s610_s7 + $0x18] sm:$0xff] %vm41_vm0, %v366_v63 }

// kernel: triple_selector_forward.19
= control target key start
LH: loop header
LB: loop body
LE: loop exit
PB: predicated region body
PF: predicated region fallthrough
CT: control target
= control target key end

     0   :  { %v368_v1 = vmov 0.0   ;;  %vm369_vm0 = vmmov 0   ;;  %s460_s0 = inlined_call_operand.vmem [shape: f32[32,32], index: 0, kind: input, shape index: {}]   ;;  %s461_s1 = inlined_call_operand.vmem [shape: f32[2,32], index: 1, kind: input, shape index: {}]   ;;  %s462_s2 = inlined_call_operand.vmem [shape: f32[32,32], index: 2, kind: input, shape index: {}]   ;;  %s463_s3 = inlined_call_operand.vmem [shape: f32[1,32], index: 3, kind: input, shape index: {}]   ;;  %s464_s4 = inlined_call_operand.vmem [shape: f32[32,2], index: 4, kind: input, shape index: {}]   ;;  %s465_s5 = inlined_call_operand.vmem [shape: f32[1,2], index: 5, kind: input, shape index: {}]   ;;  %s466_s6 = inlined_call_operand.hbm [shape: f32[2,2], index: 6, kind: output, shape index: {}]  }
   0x1   :  { %v28_v0 = vld [vmem:[%s460_s0 + $0x18] sm:$0xff]  ;;  %308 = vmatprep.subr.mxu0 %v368_v1  ;;  %v27_v2 = vld [vmem:[%s460_s0 + $0x10] sm:$0xff]  ;;  %316 = vmatprep.mubr.msk.f32.mxu0 %vm369_vm0, %v368_v1 }
   0x2   :  { %v106_v3 = vld [vmem:[%s462_s2 + $0x18] sm:$0xff]  ;;  %309 = vmatpush3.msra.mxu0 %v28_v0  ;;  %319 = vmatprep.subr.mxu1 %v368_v1  ;;  %v105_v4 = vld [vmem:[%s462_s2 + $0x10] sm:$0xff] }
   0x3   :  { %11 = vsyncpa [#allocation3], 0  ;;  %310 = vmatprep.subr.mxu0 %v368_v1  ;;  %v26_v5 = vld [vmem:[%s460_s0 + $0x8] sm:$0xff]  ;;  %320 = vmatpush3.msra.mxu1 %v106_v3  ;;  %v25_v7 = vld [vmem:[%s460_s0] sm:$0xff]  ;;  %vm29_vm1 = vcmask 261120   ;;  %s370_s24 = smov [#allocation2]  }
   0x4   :  { %311 = vmatpush3.msra.mxu0 %v27_v2  ;;  %321 = vmatprep.subr.mxu1 %v368_v1  ;;  %v104_v6 = vld [vmem:[%s462_s2 + $0x8] sm:$0xff]  ;;  %v24_v8 = vld [vmem:[%s461_s1] sm:$0x3]  ;;  %v191_v12 = vld [vmem:[%s464_s4 + $0x18] sm:$0xff]  ;;  %vm272_vm2 = vcmask 9216  }
   0x5   :  { %312 = vmatprep.subr.mxu0 %v368_v1  ;;  %322 = vmatpush3.msra.mxu1 %v105_v4  ;;  %v103_v9 = vld [vmem:[%s462_s2] sm:$0xff]  ;;  %v190_v13 = vld [vmem:[%s464_s4 + $0x10] sm:$0xff]  ;;  %v189_v14 = vld [vmem:[%s464_s4 + $0x8] sm:$0xff] }
   0x6   :  { %313 = vmatpush3.msra.mxu0 %v26_v5  ;;  %323 = vmatprep.subr.mxu1 %v368_v1  ;;  %v188_v15 = vld [vmem:[%s464_s4] sm:$0xff]  ;;  %s280_s4 = sshll.u32 %s370_s24, 4  ;;  %s281_s4 = int_to_ptr.vmem [resolvable:$true] %s280_s4 }
   0x7   :  { %314 = vmatprep.subr.mxu0 %v368_v1  ;;  %324 = vmatpush3.msra.mxu1 %v104_v6  ;;  %v289_v16 = vld [vmem:[%s463_s3] ss:$0 sm:$0xff]  ;;  %s346_s3 = scalar_lea.vmem %s281_s4, 32  ;;  %p351_p1 = scmp.lt.s32.totalorder %s281_s4, %s281_s4 }
   0x8   :  { %315 = vmatpush3.msra.mxu0 %v25_v7  ;;  %325 = vmatprep.subr.mxu1 %v368_v1  ;;  %v291_v21 = vld [vmem:[%s465_s5] ss:$0 sm:$0xff]  ;;  %p347_p0 = scmp.ne.s32.totalorder %s281_s4, %s346_s3  ;;  %p352_p2 = scmp.lt.s32.totalorder %s346_s3, %s346_s3 }
   0x9   :  { %317 = vmatmul.mubr.msk.f32.vlgmr.msra.gmra.mxu0 %vm29_vm1, %v24_v8  ;;  %327 = vmatprep.mubr.msk.f32.mxu1 %vm369_vm0, %v368_v1 }
   0xa   :  { %330 = vmatprep.subr.mxu0 %v368_v1  ;;  %338 = vmatprep.mubr.msk.f32.mxu0 %vm369_vm0, %v368_v1  ;;  %p353_p3 = por %p352_p2, %p351_p1 }
   0xb   :  { %326 = vmatpush3.msra.mxu1 %v103_v9  ;;  %331 = vmatpush3.msra.mxu0 %v191_v12 }
   0xc   :  { %332 = vmatprep.subr.mxu0 %v368_v1  ;;  %p354_p4 = pnand %p353_p3, %p347_p0 }
   0xd   :  { %333 = vmatpush3.msra.mxu0 %v190_v13 }
   0xe   :  { %334 = vmatprep.subr.mxu0 %v368_v1 }
   0xf   :  { %335 = vmatpush3.msra.mxu0 %v189_v14 }
  0x10   :  { %336 = vmatprep.subr.mxu0 %v368_v1 }
  0x11   :  { %337 = vmatpush3.msra.mxu0 %v188_v15 }
  0xc9   :  { %v99_v10 = vpop.f32.mrf.mxu0 }
  0xca   :  { %328 = vmatmul.mubr.msk.f32.vlgmr.msra.gmra.mxu1 %vm29_vm1, %v99_v10 }
  0xcb   :  { %v318_v11 = vpop.f32.mrf.mxu0 }
 0x18a   :  { %v183_v17 = vpop.f32.mrf.mxu1 }
 0x18b   :  { %v184_v18 = vadd.f32 %v289_v16, %v183_v17 }
 0x18c   :  { %v329_v19 = vpop.f32.mrf.mxu1 }
 0x18d   :  { %344 = vtanh.f32 %v184_v18 }
 0x19a   :  { %v345_v20 = vpop.eup %344 }
 0x19b   :  { %339 = vmatmul.mubr.msk.f32.vlgmr.msra.gmra.mxu0 %vm29_vm1, %v345_v20 }
 0x25b   :  { %v268_v22 = vpop.f32.mrf.mxu0 }
 0x25c   :  { %v269_v23 = vadd.f32 %v291_v21, %v268_v22 }
 0x25d   :  { %v340_v24 = vpop.f32.mrf.mxu0 }
 0x25e   :  { %273 = vst.msk [vmem:[#allocation2] sm:$0x3] %vm272_vm2, %v269_v23 }
 0x25f   :  { %357 = shalt.err (!%p354_p4)
}
 0x260   :  { %283 = dma.vmem_to_hbm [thread:$0]  %s281_s4, 32, %s466_s6, [#allocation3]  }
 0x261   :  { %366 = dma.done.wait [#allocation3], 32  }
 0x262   :  { %367 = vsyncadd [#allocation3], 4294967264 }
 0x263   :  { %287 = vsyncpa [#allocation3], 1 }

</bundles_post_ra>
